<compile_context>
chip_gen: v6e
topology: v6e:2x2x1
jax: 0.10.0
libtpu: 0.0.40
codegen_flags: <defaults>
</compile_context>

<pallas_src>
import functools
import math

import jax
import jax.numpy as jnp
import numpy as np
from jax.experimental import pallas as pl
from jax.experimental.pallas import tpu as pltpu

LN_EPS = 1e-5


# ------------------------------ kernel helpers ------------------------------ #

def _layernorm(x, w, b):
    # PyTorch nn.LayerNorm: population variance, eps inside the sqrt.
    mu = jnp.mean(x, axis=-1, keepdims=True)
    var = jnp.mean((x - mu) ** 2, axis=-1, keepdims=True)
    return (x - mu) * jax.lax.rsqrt(var + LN_EPS) * w + b


def _gelu_exact(x):
    # nn.GELU() default = exact erf formulation.
    return 0.5 * x * (1.0 + jax.lax.erf(x * (1.0 / math.sqrt(2.0))))


# ------------------------------- Pallas kernel ------------------------------ #

def encoder_kernel(x_ref, ln1w_ref, ln1b_ref, wqkv_ref, bqkv_ref,
                   wo_ref, bo_ref, ln2w_ref, ln2b_ref,
                   w1_ref, b1_ref, w2_ref, b2_ref,
                   o_ref, acc_ref, *, n_heads):
    d = pl.program_id(1)                     # depth (sequential, "arbitrary") axis

    # Seed the carried activation from the HBM input on the first depth step.
    @pl.when(d == 0)
    def _():
        acc_ref[...] = x_ref[0]

    x = acc_ref[...]                         # (S, E) f32, carried across depth
    S, E = x.shape
    hd = E // n_heads

    # ---------------- LayerNorm1 + multi-head self-attention ---------------- #
    h = _layernorm(x, ln1w_ref[0, 0], ln1b_ref[0, 0])

    # Fused QKV projection. The 1/sqrt(head_dim) attention scale is already
    # folded into the Q slice of wqkv / bqkv on the host.
    qkv = jnp.dot(h.astype(jnp.bfloat16), wqkv_ref[0],
                  preferred_element_type=jnp.float32) + bqkv_ref[0, 0]

    q = qkv[:, :E].reshape(S, n_heads, hd).astype(jnp.bfloat16)
    k = qkv[:, E:2 * E].reshape(S, n_heads, hd).astype(jnp.bfloat16)
    v = qkv[:, 2 * E:].reshape(S, n_heads, hd).astype(jnp.bfloat16)

    # Head-batched QK^T: one dot_general for all heads, no per-head slices,
    # no explicit transpose of K.
    s = jnp.einsum('qhd,khd->hqk', q, k,
                   preferred_element_type=jnp.float32)       # (H, S, S)

    # softmax over keys; denominator reciprocal goes to the EUP slot.
    s = s - jnp.max(s, axis=-1, keepdims=True)
    e = jnp.exp(s)
    p = e * pl.reciprocal(jnp.sum(e, axis=-1, keepdims=True), approx=True)

    # Head-batched PV, written straight back to (S, E) layout.
    ctx = jnp.einsum('hqk,khd->qhd', p.astype(jnp.bfloat16), v,
                     preferred_element_type=jnp.float32).reshape(S, E)

    att = jnp.dot(ctx.astype(jnp.bfloat16), wo_ref[0],
                  preferred_element_type=jnp.float32) + bo_ref[0, 0]
    x1 = x + att                             # residual 1 (dropout = identity)

    # --------------------------- LayerNorm2 + MLP ---------------------------- #
    h2 = _layernorm(x1, ln2w_ref[0, 0], ln2b_ref[0, 0])
    m = jnp.dot(h2.astype(jnp.bfloat16), w1_ref[0],
                preferred_element_type=jnp.float32) + b1_ref[0, 0]
    m = _gelu_exact(m)                       # MLP dropout = identity at inference
    m = jnp.dot(m.astype(jnp.bfloat16), w2_ref[0],
                preferred_element_type=jnp.float32) + b2_ref[0, 0]

    acc_ref[...] = x1 + m                    # residual 2; carried to next layer

    # Emit the final activation once, after the last layer for this batch slab.
    @pl.when(d == pl.num_programs(1) - 1)
    def _():
        o_ref[0] = acc_ref[...]


# -------------------------------- JAX wrapper -------------------------------- #

def transformer_encoder(x_sbe, dev, n_heads):
    """Full TransformerEncoder forward.  x_sbe: (S, B, E), PyTorch seq-first."""
    x = jnp.transpose(x_sbe, (1, 0, 2)).astype(jnp.float32)   # (B, S, E)
    B, S, E = x.shape
    depth = dev["wqkv"].shape[0]
    H = dev["w1"].shape[-1]

    def x_map(b, d):  # activation / output: one (S, E) slab per batch element
        return (b, 0, 0)

    def w_map(b, d):  # stacked per-layer weights: indexed by the depth axis
        return (d, 0, 0)

    # VMEM budget: double-buffered per-depth weight block + activation slabs +
    # in-kernel temporaries; clamped to 64 MiB so it is valid on v7x as well.
    per_depth_weight_bytes = sum(
        int(np.prod(v.shape[1:])) * v.dtype.itemsize for v in dev.values())
    act_bytes = S * E * 4
    tmp_bytes = (S * 3 * E * 4 + S * H * 4            # qkv proj / MLP hidden
                 + 2 * n_heads * S * S * 4            # scores + probs
                 + 4 * S * E * 4)                     # misc f32/bf16 temporaries
    est = 2 * (per_depth_weight_bytes + 2 * act_bytes) + tmp_bytes + act_bytes
    vmem_limit = int(min(64 * 2**20, max(2 * est, 32 * 2**20)))

    kernel = functools.partial(encoder_kernel, n_heads=n_heads)

    out = pl.pallas_call(
        kernel,
        out_shape=jax.ShapeDtypeStruct((B, S, E), jnp.float32),
        grid=(B, depth),
        in_specs=[
            pl.BlockSpec((1, S, E), x_map),                                 # x
            pl.BlockSpec((1, 1, E), w_map), pl.BlockSpec((1, 1, E), w_map),  # ln1 w/b
            pl.BlockSpec((1, E, 3 * E), w_map),                             # wqkv (bf16)
            pl.BlockSpec((1, 1, 3 * E), w_map),                             # bqkv
            pl.BlockSpec((1, E, E), w_map), pl.BlockSpec((1, 1, E), w_map),  # wo/bo
            pl.BlockSpec((1, 1, E), w_map), pl.BlockSpec((1, 1, E), w_map),  # ln2 w/b
            pl.BlockSpec((1, E, H), w_map), pl.BlockSpec((1, 1, H), w_map),  # fc1
            pl.BlockSpec((1, H, E), w_map), pl.BlockSpec((1, 1, E), w_map),  # fc2
        ],
        out_specs=pl.BlockSpec((1, S, E), x_map),
        scratch_shapes=[pltpu.VMEM((S, E), jnp.float32)],   # depth-carried activation
        compiler_params=pltpu.CompilerParams(
            dimension_semantics=("parallel", "arbitrary"),
            vmem_limit_bytes=vmem_limit),
    )(x,
      dev["ln1w"], dev["ln1b"], dev["wqkv"], dev["bqkv"],
      dev["wo"], dev["bo"], dev["ln2w"], dev["ln2b"],
      dev["w1"], dev["b1"], dev["w2"], dev["b2"])

    return jnp.transpose(out, (1, 0, 2))                    # back to (S, B, E)


# --------------------------- parameters (host side) --------------------------- #

def init_params(key, depth, emb_dim, mlp_expansion):
    """Master f32 parameters, one dict per layer.  Linear weights stored (in, out)."""
    H = mlp_expansion * emb_dim
    layers = []
    for _ in range(depth):
        key, k0, k1, k2, k3, k4, k5 = jax.random.split(key, 7)
        layers.append(dict(
            ln1w=jnp.ones((emb_dim,), jnp.float32),
            ln1b=jnp.zeros((emb_dim,), jnp.float32),
            wqkv=0.05 * jax.random.normal(k0, (emb_dim, 3 * emb_dim), jnp.float32),
            bqkv=0.02 * jax.random.normal(k1, (3 * emb_dim,), jnp.float32),
            wo=0.05 * jax.random.normal(k2, (emb_dim, emb_dim), jnp.float32),
            bo=jnp.zeros((emb_dim,), jnp.float32),
            ln2w=jnp.ones((emb_dim,), jnp.float32),
            ln2b=jnp.zeros((emb_dim,), jnp.float32),
            w1=0.05 * jax.random.normal(k3, (emb_dim, H), jnp.float32),
            b1=0.02 * jax.random.normal(k4, (H,), jnp.float32),
            w2=0.05 * jax.random.normal(k5, (H, emb_dim), jnp.float32),
            b2=jnp.zeros((emb_dim,), jnp.float32),
        ))
    return layers


def pack_params(layers, n_heads):
    """Stack per-layer params on a depth axis, fold the 1/sqrt(head_dim) scale
    into the Q slice of the QKV projection, and cast matmul weights to bf16."""
    E = layers[0]["wqkv"].shape[0]
    hd = E // n_heads
    scale = 1.0 / math.sqrt(hd)

    def stack(name):
        return jnp.stack([l[name] for l in layers], axis=0)

    wqkv = stack("wqkv").at[:, :, :E].multiply(scale)
    bqkv = stack("bqkv").at[:, :E].multiply(scale)

    def vec(a):                      # (depth, N) -> (depth, 1, N) lane-friendly blocks
        return a[:, None, :]

    return dict(
        ln1w=vec(stack("ln1w")), ln1b=vec(stack("ln1b")),
        wqkv=wqkv.astype(jnp.bfloat16), bqkv=vec(bqkv),
        wo=stack("wo").astype(jnp.bfloat16), bo=vec(stack("bo")),
        ln2w=vec(stack("ln2w")), ln2b=vec(stack("ln2b")),
        w1=stack("w1").astype(jnp.bfloat16), b1=vec(stack("b1")),
        w2=stack("w2").astype(jnp.bfloat16), b2=vec(stack("b2")),
    )


# ----------------------------- pure-JAX reference ----------------------------- #

def reference_forward(x_sbe, layers, n_heads):
    """Full-f32 reference matching the PyTorch module semantics (eval mode)."""
    x = jnp.transpose(x_sbe, (1, 0, 2)).astype(jnp.float32)   # (B, S, E)
    B, S, E = x.shape
    hd = E // n_heads

    def ln(t, w, b):
        mu = jnp.mean(t, -1, keepdims=True)
        var = jnp.mean((t - mu) ** 2, -1, keepdims=True)
        return (t - mu) / jnp.sqrt(var + LN_EPS) * w + b

    for lyr in layers:
        h = ln(x, lyr["ln1w"], lyr["ln1b"])
        qkv = h @ lyr["wqkv"] + lyr["bqkv"]
        q, k, v = qkv[..., :E], qkv[..., E:2 * E], qkv[..., 2 * E:]
        qh = q.reshape(B, S, n_heads, hd)
        kh = k.reshape(B, S, n_heads, hd)
        vh = v.reshape(B, S, n_heads, hd)
        s = jnp.einsum("bqhd,bkhd->bhqk", qh, kh) / jnp.sqrt(jnp.float32(hd))
        p = jax.nn.softmax(s, axis=-1)
        ctx = jnp.einsum("bhqk,bkhd->bqhd", p, vh).reshape(B, S, E)
        att = ctx @ lyr["wo"] + lyr["bo"]
        x = x + att
        h2 = ln(x, lyr["ln2w"], lyr["ln2b"])
        m = h2 @ lyr["w1"] + lyr["b1"]
        m = 0.5 * m * (1.0 + jax.lax.erf(m / jnp.sqrt(jnp.float32(2.0))))
        m = m @ lyr["w2"] + lyr["b2"]
        x = x + m
    return jnp.transpose(x, (1, 0, 2))


# ------------------------------------ main ------------------------------------ #

if __name__ == "__main__":
    depth = 2
    emb_dim = 128          # lane-dense (multiple of 128)
    n_heads = 4            # head_dim = 32
    mlp_expansion = 4      # hidden = 512
    S, B = 8, 2            # (seq, batch); sublane-friendly S

    key = jax.random.PRNGKey(0)
    kx, kp = jax.random.split(key)
    x = jax.random.normal(kx, (S, B, emb_dim), jnp.float32)   # (seq, batch, emb)

    master = init_params(kp, depth, emb_dim, mlp_expansion)   # f32 source of truth
    dev = pack_params(master, n_heads)                        # stacked / scaled / bf16

    fwd = jax.jit(functools.partial(transformer_encoder, n_heads=n_heads))
    out = jax.block_until_ready(fwd(x, dev))

    ref = reference_forward(x, master, n_heads)
    assert out.shape == (S, B, emb_dim)
    # Tolerance reflects the bf16 matmul operands + approx softmax reciprocal in
    # the kernel versus the full-f32 reference.
    np.testing.assert_allclose(np.asarray(out), np.asarray(ref), rtol=1e-2, atol=1e-2)

    print("KERNEL_OK")
</pallas_src>

<mosaic_0001>
module attributes {stable_mosaic.version = 11 : i64} {
  func.func @encoder_kernel(%arg0: i32, %arg1: i32, %arg2: memref<1x8x128xf32, #tpu.memory_space<vmem>>, %arg3: memref<1x1x128xf32, #tpu.memory_space<vmem>>, %arg4: memref<1x1x128xf32, #tpu.memory_space<vmem>>, %arg5: memref<1x128x384xbf16, #tpu.memory_space<vmem>>, %arg6: memref<1x1x384xf32, #tpu.memory_space<vmem>>, %arg7: memref<1x128x128xbf16, #tpu.memory_space<vmem>>, %arg8: memref<1x1x128xf32, #tpu.memory_space<vmem>>, %arg9: memref<1x1x128xf32, #tpu.memory_space<vmem>>, %arg10: memref<1x1x128xf32, #tpu.memory_space<vmem>>, %arg11: memref<1x128x512xbf16, #tpu.memory_space<vmem>>, %arg12: memref<1x1x512xf32, #tpu.memory_space<vmem>>, %arg13: memref<1x512x128xbf16, #tpu.memory_space<vmem>>, %arg14: memref<1x1x128xf32, #tpu.memory_space<vmem>>, %arg15: memref<1x8x128xf32, #tpu.memory_space<vmem>>, %arg16: memref<8x128xf32, #tpu.memory_space<vmem>>) attributes {dimension_semantics = [#tpu.dimension_semantics<parallel>, #tpu.dimension_semantics<arbitrary>], iteration_bounds = array<i64: 2, 2>, scalar_prefetch = 0 : i64, scratch_operands = 1 : i64, tpu.core_type = #tpu.core_type<tc>, window_params = [{transform_indices = @transform_0, window_bounds = array<i64: 1, 8, 128>}, {transform_indices = @transform_1, window_bounds = array<i64: 1, 1, 128>}, {transform_indices = @transform_2, window_bounds = array<i64: 1, 1, 128>}, {transform_indices = @transform_3, window_bounds = array<i64: 1, 128, 384>}, {transform_indices = @transform_4, window_bounds = array<i64: 1, 1, 384>}, {transform_indices = @transform_5, window_bounds = array<i64: 1, 128, 128>}, {transform_indices = @transform_6, window_bounds = array<i64: 1, 1, 128>}, {transform_indices = @transform_7, window_bounds = array<i64: 1, 1, 128>}, {transform_indices = @transform_8, window_bounds = array<i64: 1, 1, 128>}, {transform_indices = @transform_9, window_bounds = array<i64: 1, 128, 512>}, {transform_indices = @transform_10, window_bounds = array<i64: 1, 1, 512>}, {transform_indices = @transform_11, window_bounds = array<i64: 1, 512, 128>}, {transform_indices = @transform_12, window_bounds = array<i64: 1, 1, 128>}, {transform_indices = @transform_13, window_bounds = array<i64: 1, 8, 128>}]} {
    %c0_i32 = arith.constant 0 : i32
    %0 = arith.cmpi eq, %arg1, %c0_i32 : i32
    %1 = arith.extui %0 : i1 to i32
    %c0_i32_0 = arith.constant 0 : i32
    %2 = arith.cmpi ne, %1, %c0_i32_0 : i32
    scf.if %2 {
      %c0_61 = arith.constant 0 : index
      %c0_62 = arith.constant 0 : index
      %c0_63 = arith.constant 0 : index
      %134 = vector.load %arg2[%c0_61, %c0_62, %c0_63] : memref<1x8x128xf32, #tpu.memory_space<vmem>>, vector<1x8x128xf32>
      %135 = vector.shape_cast %134 : vector<1x8x128xf32> to vector<8x128xf32>
      %c0_64 = arith.constant 0 : index
      %c0_65 = arith.constant 0 : index
      %136 = vector.load %arg16[%c0_64, %c0_65] : memref<8x128xf32, #tpu.memory_space<vmem>>, vector<8x128xf32>
      tpu.vector_store %arg16[%c0_64, %c0_65], %135 {strides = array<i32>} : memref<8x128xf32, #tpu.memory_space<vmem>>, vector<8x128xf32>,
    } else {
    }
    %c0 = arith.constant 0 : index
    %c0_1 = arith.constant 0 : index
    %3 = vector.load %arg16[%c0, %c0_1] : memref<8x128xf32, #tpu.memory_space<vmem>>, vector<8x128xf32>
    %c0_2 = arith.constant 0 : index
    %c0_3 = arith.constant 0 : index
    %c0_4 = arith.constant 0 : index
    %4 = vector.load %arg3[%c0_2, %c0_3, %c0_4] : memref<1x1x128xf32, #tpu.memory_space<vmem>>, vector<1x1x128xf32>
    %5 = vector.shape_cast %4 : vector<1x1x128xf32> to vector<128xf32>
    %c0_5 = arith.constant 0 : index
    %c0_6 = arith.constant 0 : index
    %c0_7 = arith.constant 0 : index
    %6 = vector.load %arg4[%c0_5, %c0_6, %c0_7] : memref<1x1x128xf32, #tpu.memory_space<vmem>>, vector<1x1x128xf32>
    %7 = vector.shape_cast %6 : vector<1x1x128xf32> to vector<128xf32>
    %cst = arith.constant dense<0.000000e+00> : vector<8xf32>
    %8 = vector.multi_reduction <add>, %3, %cst [1] : vector<8x128xf32> to vector<8xf32>
    %9 = vector.shape_cast %8 : vector<8xf32> to vector<8x1xf32>
    %cst_8 = arith.constant 1.280000e+02 : f32
    %10 = vector.broadcast %cst_8 : f32 to vector<8x1xf32>
    %11 = arith.divf %9, %10 : vector<8x1xf32>
    %12 = vector.broadcast %11 : vector<8x1xf32> to vector<8x128xf32>
    %13 = arith.subf %3, %12 : vector<8x128xf32>
    %14 = arith.mulf %13, %13 : vector<8x128xf32>
    %cst_9 = arith.constant dense<0.000000e+00> : vector<8xf32>
    %15 = vector.multi_reduction <add>, %14, %cst_9 [1] : vector<8x128xf32> to vector<8xf32>
    %16 = vector.shape_cast %15 : vector<8xf32> to vector<8x1xf32>
    %cst_10 = arith.constant 1.280000e+02 : f32
    %17 = vector.broadcast %cst_10 : f32 to vector<8x1xf32>
    %18 = arith.divf %16, %17 : vector<8x1xf32>
    %19 = vector.broadcast %11 : vector<8x1xf32> to vector<8x128xf32>
    %20 = arith.subf %3, %19 : vector<8x128xf32>
    %cst_11 = arith.constant 9.99999974E-6 : f32
    %21 = vector.broadcast %cst_11 : f32 to vector<8x1xf32>
    %22 = arith.addf %18, %21 : vector<8x1xf32>
    %23 = math.rsqrt %22 : vector<8x1xf32>
    %24 = vector.broadcast %23 : vector<8x1xf32> to vector<8x128xf32>
    %25 = arith.mulf %20, %24 : vector<8x128xf32>
    %26 = vector.shape_cast %5 : vector<128xf32> to vector<1x128xf32>
    %27 = vector.broadcast %26 : vector<1x128xf32> to vector<8x128xf32>
    %28 = arith.mulf %25, %27 : vector<8x128xf32>
    %29 = vector.shape_cast %7 : vector<128xf32> to vector<1x128xf32>
    %30 = vector.broadcast %29 : vector<1x128xf32> to vector<8x128xf32>
    %31 = arith.addf %28, %30 : vector<8x128xf32>
    %32 = arith.truncf %31 : vector<8x128xf32> to vector<8x128xbf16>
    %c0_12 = arith.constant 0 : index
    %c0_13 = arith.constant 0 : index
    %c0_14 = arith.constant 0 : index
    %33 = vector.load %arg5[%c0_12, %c0_13, %c0_14] : memref<1x128x384xbf16, #tpu.memory_space<vmem>>, vector<1x128x384xbf16>
    %34 = vector.shape_cast %33 : vector<1x128x384xbf16> to vector<128x384xbf16>
    %cst_15 = arith.constant dense<0.000000e+00> : vector<8x384xf32>
    %35 = tpu.matmul %32, %34, %cst_15 {dimension_numbers = #tpu.dot_dimension_numbers<[1], [0], [0], [1], [0, 0, 1, 1], [], []>} : vector<8x128xbf16>, vector<128x384xbf16>, vector<8x384xf32> -> vector<8x384xf32>
    %c0_16 = arith.constant 0 : index
    %c0_17 = arith.constant 0 : index
    %c0_18 = arith.constant 0 : index
    %36 = vector.load %arg6[%c0_16, %c0_17, %c0_18] : memref<1x1x384xf32, #tpu.memory_space<vmem>>, vector<1x1x384xf32>
    %37 = vector.shape_cast %36 : vector<1x1x384xf32> to vector<384xf32>
    %38 = vector.shape_cast %37 : vector<384xf32> to vector<1x384xf32>
    %39 = vector.broadcast %38 : vector<1x384xf32> to vector<8x384xf32>
    %40 = arith.addf %35, %39 : vector<8x384xf32>
    %41 = vector.extract_strided_slice %40 {offsets = [0, 0], sizes = [8, 128], strides = [1, 1]} : vector<8x384xf32> to vector<8x128xf32>
    %42 = vector.shape_cast %41 : vector<8x128xf32> to vector<8x4x32xf32>
    %43 = arith.truncf %42 : vector<8x4x32xf32> to vector<8x4x32xbf16>
    %44 = vector.extract_strided_slice %40 {offsets = [0, 128], sizes = [8, 128], strides = [1, 1]} : vector<8x384xf32> to vector<8x128xf32>
    %45 = vector.shape_cast %44 : vector<8x128xf32> to vector<8x4x32xf32>
    %46 = arith.truncf %45 : vector<8x4x32xf32> to vector<8x4x32xbf16>
    %47 = vector.extract_strided_slice %40 {offsets = [0, 256], sizes = [8, 128], strides = [1, 1]} : vector<8x384xf32> to vector<8x128xf32>
    %48 = vector.shape_cast %47 : vector<8x128xf32> to vector<8x4x32xf32>
    %49 = arith.truncf %48 : vector<8x4x32xf32> to vector<8x4x32xbf16>
    "tpu.trace_start"() <{level = 10 : i32, message = "qhd,khd->hqk"}> : () -> ()
    %cst_19 = arith.constant dense<0.000000e+00> : vector<4x8x8xf32>
    %50 = tpu.matmul %43, %46, %cst_19 {dimension_numbers = #tpu.dot_dimension_numbers<[2], [2], [0], [0], [0, 1, 0, 0, 1, 0], [1], [1]>} : vector<8x4x32xbf16>, vector<8x4x32xbf16>, vector<4x8x8xf32> -> vector<4x8x8xf32>
    "tpu.trace_stop"() : () -> ()
    %cst_20 = arith.constant dense<0xFF800000> : vector<4x8xf32>
    %51 = vector.multi_reduction <maximumf>, %50, %cst_20 [2] : vector<4x8x8xf32> to vector<4x8xf32>
    %52 = vector.shape_cast %51 : vector<4x8xf32> to vector<4x8x1xf32>
    %53 = vector.broadcast %52 : vector<4x8x1xf32> to vector<4x8x8xf32>
    %54 = arith.subf %50, %53 : vector<4x8x8xf32>
    %55 = math.exp %54 : vector<4x8x8xf32>
    %cst_21 = arith.constant dense<0.000000e+00> : vector<4x8xf32>
    %56 = vector.multi_reduction <add>, %55, %cst_21 [2] : vector<4x8x8xf32> to vector<4x8xf32>
    %57 = vector.shape_cast %56 : vector<4x8xf32> to vector<4x8x1xf32>
    %58 = tpu.reciprocal %57 {approx = true} : vector<4x8x1xf32> -> vector<4x8x1xf32>
    %59 = vector.broadcast %58 : vector<4x8x1xf32> to vector<4x8x8xf32>
    %60 = arith.mulf %55, %59 : vector<4x8x8xf32>
    %61 = arith.truncf %60 : vector<4x8x8xf32> to vector<4x8x8xbf16>
    "tpu.trace_start"() <{level = 10 : i32, message = "hqk,khd->qhd"}> : () -> ()
    %cst_22 = arith.constant dense<0.000000e+00> : vector<4x32x8xf32>
    %62 = tpu.matmul %49, %61, %cst_22 {dimension_numbers = #tpu.dot_dimension_numbers<[0], [2], [2], [1], [0, 1, 0, 2, 1, 1], [1], [0]>} : vector<8x4x32xbf16>, vector<4x8x8xbf16>, vector<4x32x8xf32> -> vector<4x32x8xf32>
    %63 = tpu.transpose %62, [2, 0, 1] : vector<4x32x8xf32> -> vector<8x4x32xf32>
    "tpu.trace_stop"() : () -> ()
    %64 = vector.shape_cast %63 : vector<8x4x32xf32> to vector<8x128xf32>
    %65 = arith.truncf %64 : vector<8x128xf32> to vector<8x128xbf16>
    %c0_23 = arith.constant 0 : index
    %c0_24 = arith.constant 0 : index
    %c0_25 = arith.constant 0 : index
    %66 = vector.load %arg7[%c0_23, %c0_24, %c0_25] : memref<1x128x128xbf16, #tpu.memory_space<vmem>>, vector<1x128x128xbf16>
    %67 = vector.shape_cast %66 : vector<1x128x128xbf16> to vector<128x128xbf16>
    %cst_26 = arith.constant dense<0.000000e+00> : vector<8x128xf32>
    %68 = tpu.matmul %65, %67, %cst_26 {dimension_numbers = #tpu.dot_dimension_numbers<[1], [0], [0], [1], [0, 0, 1, 1], [], []>} : vector<8x128xbf16>, vector<128x128xbf16>, vector<8x128xf32> -> vector<8x128xf32>
    %c0_27 = arith.constant 0 : index
    %c0_28 = arith.constant 0 : index
    %c0_29 = arith.constant 0 : index
    %69 = vector.load %arg8[%c0_27, %c0_28, %c0_29] : memref<1x1x128xf32, #tpu.memory_space<vmem>>, vector<1x1x128xf32>
    %70 = vector.shape_cast %69 : vector<1x1x128xf32> to vector<128xf32>
    %71 = vector.shape_cast %70 : vector<128xf32> to vector<1x128xf32>
    %72 = vector.broadcast %71 : vector<1x128xf32> to vector<8x128xf32>
    %73 = arith.addf %68, %72 : vector<8x128xf32>
    %74 = arith.addf %3, %73 : vector<8x128xf32>
    %c0_30 = arith.constant 0 : index
    %c0_31 = arith.constant 0 : index
    %c0_32 = arith.constant 0 : index
    %75 = vector.load %arg9[%c0_30, %c0_31, %c0_32] : memref<1x1x128xf32, #tpu.memory_space<vmem>>, vector<1x1x128xf32>
    %76 = vector.shape_cast %75 : vector<1x1x128xf32> to vector<128xf32>
    %c0_33 = arith.constant 0 : index
    %c0_34 = arith.constant 0 : index
    %c0_35 = arith.constant 0 : index
    %77 = vector.load %arg10[%c0_33, %c0_34, %c0_35] : memref<1x1x128xf32, #tpu.memory_space<vmem>>, vector<1x1x128xf32>
    %78 = vector.shape_cast %77 : vector<1x1x128xf32> to vector<128xf32>
    %cst_36 = arith.constant dense<0.000000e+00> : vector<8xf32>
    %79 = vector.multi_reduction <add>, %74, %cst_36 [1] : vector<8x128xf32> to vector<8xf32>
    %80 = vector.shape_cast %79 : vector<8xf32> to vector<8x1xf32>
    %cst_37 = arith.constant 1.280000e+02 : f32
    %81 = vector.broadcast %cst_37 : f32 to vector<8x1xf32>
    %82 = arith.divf %80, %81 : vector<8x1xf32>
    %83 = vector.broadcast %82 : vector<8x1xf32> to vector<8x128xf32>
    %84 = arith.subf %74, %83 : vector<8x128xf32>
    %85 = arith.mulf %84, %84 : vector<8x128xf32>
    %cst_38 = arith.constant dense<0.000000e+00> : vector<8xf32>
    %86 = vector.multi_reduction <add>, %85, %cst_38 [1] : vector<8x128xf32> to vector<8xf32>
    %87 = vector.shape_cast %86 : vector<8xf32> to vector<8x1xf32>
    %cst_39 = arith.constant 1.280000e+02 : f32
    %88 = vector.broadcast %cst_39 : f32 to vector<8x1xf32>
    %89 = arith.divf %87, %88 : vector<8x1xf32>
    %90 = vector.broadcast %82 : vector<8x1xf32> to vector<8x128xf32>
    %91 = arith.subf %74, %90 : vector<8x128xf32>
    %cst_40 = arith.constant 9.99999974E-6 : f32
    %92 = vector.broadcast %cst_40 : f32 to vector<8x1xf32>
    %93 = arith.addf %89, %92 : vector<8x1xf32>
    %94 = math.rsqrt %93 : vector<8x1xf32>
    %95 = vector.broadcast %94 : vector<8x1xf32> to vector<8x128xf32>
    %96 = arith.mulf %91, %95 : vector<8x128xf32>
    %97 = vector.shape_cast %76 : vector<128xf32> to vector<1x128xf32>
    %98 = vector.broadcast %97 : vector<1x128xf32> to vector<8x128xf32>
    %99 = arith.mulf %96, %98 : vector<8x128xf32>
    %100 = vector.shape_cast %78 : vector<128xf32> to vector<1x128xf32>
    %101 = vector.broadcast %100 : vector<1x128xf32> to vector<8x128xf32>
    %102 = arith.addf %99, %101 : vector<8x128xf32>
    %103 = arith.truncf %102 : vector<8x128xf32> to vector<8x128xbf16>
    %c0_41 = arith.constant 0 : index
    %c0_42 = arith.constant 0 : index
    %c0_43 = arith.constant 0 : index
    %104 = vector.load %arg11[%c0_41, %c0_42, %c0_43] : memref<1x128x512xbf16, #tpu.memory_space<vmem>>, vector<1x128x512xbf16>
    %105 = vector.shape_cast %104 : vector<1x128x512xbf16> to vector<128x512xbf16>
    %cst_44 = arith.constant dense<0.000000e+00> : vector<8x512xf32>
    %106 = tpu.matmul %103, %105, %cst_44 {dimension_numbers = #tpu.dot_dimension_numbers<[1], [0], [0], [1], [0, 0, 1, 1], [], []>} : vector<8x128xbf16>, vector<128x512xbf16>, vector<8x512xf32> -> vector<8x512xf32>
    %c0_45 = arith.constant 0 : index
    %c0_46 = arith.constant 0 : index
    %c0_47 = arith.constant 0 : index
    %107 = vector.load %arg12[%c0_45, %c0_46, %c0_47] : memref<1x1x512xf32, #tpu.memory_space<vmem>>, vector<1x1x512xf32>
    %108 = vector.shape_cast %107 : vector<1x1x512xf32> to vector<512xf32>
    %109 = vector.shape_cast %108 : vector<512xf32> to vector<1x512xf32>
    %110 = vector.broadcast %109 : vector<1x512xf32> to vector<8x512xf32>
    %111 = arith.addf %106, %110 : vector<8x512xf32>
    %cst_48 = arith.constant 5.000000e-01 : f32
    %112 = vector.broadcast %cst_48 : f32 to vector<8x512xf32>
    %113 = arith.mulf %112, %111 : vector<8x512xf32>
    %cst_49 = arith.constant 0.707106769 : f32
    %114 = vector.broadcast %cst_49 : f32 to vector<8x512xf32>
    %115 = arith.mulf %111, %114 : vector<8x512xf32>
    %116 = math.erf %115 : vector<8x512xf32>
    %cst_50 = arith.constant 1.000000e+00 : f32
    %117 = vector.broadcast %cst_50 : f32 to vector<8x512xf32>
    %118 = arith.addf %117, %116 : vector<8x512xf32>
    %119 = arith.mulf %113, %118 : vector<8x512xf32>
    %120 = arith.truncf %119 : vector<8x512xf32> to vector<8x512xbf16>
    %c0_51 = arith.constant 0 : index
    %c0_52 = arith.constant 0 : index
    %c0_53 = arith.constant 0 : index
    %121 = vector.load %arg13[%c0_51, %c0_52, %c0_53] : memref<1x512x128xbf16, #tpu.memory_space<vmem>>, vector<1x512x128xbf16>
    %122 = vector.shape_cast %121 : vector<1x512x128xbf16> to vector<512x128xbf16>
    %cst_54 = arith.constant dense<0.000000e+00> : vector<8x128xf32>
    %123 = tpu.matmul %120, %122, %cst_54 {dimension_numbers = #tpu.dot_dimension_numbers<[1], [0], [0], [1], [0, 0, 1, 1], [], []>} : vector<8x512xbf16>, vector<512x128xbf16>, vector<8x128xf32> -> vector<8x128xf32>
    %c0_55 = arith.constant 0 : index
    %c0_56 = arith.constant 0 : index
    %c0_57 = arith.constant 0 : index
    %124 = vector.load %arg14[%c0_55, %c0_56, %c0_57] : memref<1x1x128xf32, #tpu.memory_space<vmem>>, vector<1x1x128xf32>
    %125 = vector.shape_cast %124 : vector<1x1x128xf32> to vector<128xf32>
    %126 = vector.shape_cast %125 : vector<128xf32> to vector<1x128xf32>
    %127 = vector.broadcast %126 : vector<1x128xf32> to vector<8x128xf32>
    %128 = arith.addf %123, %127 : vector<8x128xf32>
    %129 = arith.addf %74, %128 : vector<8x128xf32>
    %c0_58 = arith.constant 0 : index
    %c0_59 = arith.constant 0 : index
    %130 = vector.load %arg16[%c0_58, %c0_59] : memref<8x128xf32, #tpu.memory_space<vmem>>, vector<8x128xf32>
    tpu.vector_store %arg16[%c0_58, %c0_59], %129 {strides = array<i32>} : memref<8x128xf32, #tpu.memory_space<vmem>>, vector<8x128xf32>,
    %c1_i32 = arith.constant 1 : i32
    %131 = arith.cmpi eq, %arg1, %c1_i32 : i32
    %132 = arith.extui %131 : i1 to i32
    %c0_i32_60 = arith.constant 0 : i32
    %133 = arith.cmpi ne, %132, %c0_i32_60 : i32
    scf.if %133 {
      %c0_61 = arith.constant 0 : index
      %c0_62 = arith.constant 0 : index
      %134 = vector.load %arg16[%c0_61, %c0_62] : memref<8x128xf32, #tpu.memory_space<vmem>>, vector<8x128xf32>
      %c0_63 = arith.constant 0 : index
      %c0_64 = arith.constant 0 : index
      %c0_65 = arith.constant 0 : index
      %135 = vector.load %arg15[%c0_63, %c0_64, %c0_65] : memref<1x8x128xf32, #tpu.memory_space<vmem>>, vector<1x8x128xf32>
      %136 = vector.shape_cast %135 : vector<1x8x128xf32> to vector<8x128xf32>
      %137 = vector.shape_cast %134 : vector<8x128xf32> to vector<1x8x128xf32>
      tpu.vector_store %arg15[%c0_63, %c0_64, %c0_65], %137 {strides = array<i32>} : memref<1x8x128xf32, #tpu.memory_space<vmem>>, vector<1x8x128xf32>,
    } else {
    }
    return
  }
  func.func @transform_0(%arg0: i32, %arg1: i32) -> (i32, i32, i32) {
    %c0_i32 = arith.constant 0 : i32
    %c0_i32_0 = arith.constant 0 : i32
    %c0_i32_1 = arith.constant 0 : i32
    return %arg0, %c0_i32, %c0_i32_0 : i32, i32, i32
  }
  func.func @transform_1(%arg0: i32, %arg1: i32) -> (i32, i32, i32) {
    %c0_i32 = arith.constant 0 : i32
    %c0_i32_0 = arith.constant 0 : i32
    %c0_i32_1 = arith.constant 0 : i32
    return %arg1, %c0_i32, %c0_i32_0 : i32, i32, i32
  }
  func.func @transform_2(%arg0: i32, %arg1: i32) -> (i32, i32, i32) {
    %c0_i32 = arith.constant 0 : i32
    %c0_i32_0 = arith.constant 0 : i32
    %c0_i32_1 = arith.constant 0 : i32
    return %arg1, %c0_i32, %c0_i32_0 : i32, i32, i32
  }
  func.func @transform_3(%arg0: i32, %arg1: i32) -> (i32, i32, i32) {
    %c0_i32 = arith.constant 0 : i32
    %c0_i32_0 = arith.constant 0 : i32
    %c0_i32_1 = arith.constant 0 : i32
    return %arg1, %c0_i32, %c0_i32_0 : i32, i32, i32
  }
  func.func @transform_4(%arg0: i32, %arg1: i32) -> (i32, i32, i32) {
    %c0_i32 = arith.constant 0 : i32
    %c0_i32_0 = arith.constant 0 : i32
    %c0_i32_1 = arith.constant 0 : i32
    return %arg1, %c0_i32, %c0_i32_0 : i32, i32, i32
  }
  func.func @transform_5(%arg0: i32, %arg1: i32) -> (i32, i32, i32) {
    %c0_i32 = arith.constant 0 : i32
    %c0_i32_0 = arith.constant 0 : i32
    %c0_i32_1 = arith.constant 0 : i32
    return %arg1, %c0_i32, %c0_i32_0 : i32, i32, i32
  }
  func.func @transform_6(%arg0: i32, %arg1: i32) -> (i32, i32, i32) {
    %c0_i32 = arith.constant 0 : i32
    %c0_i32_0 = arith.constant 0 : i32
    %c0_i32_1 = arith.constant 0 : i32
    return %arg1, %c0_i32, %c0_i32_0 : i32, i32, i32
  }
  func.func @transform_7(%arg0: i32, %arg1: i32) -> (i32, i32, i32) {
    %c0_i32 = arith.constant 0 : i32
    %c0_i32_0 = arith.constant 0 : i32
    %c0_i32_1 = arith.constant 0 : i32
    return %arg1, %c0_i32, %c0_i32_0 : i32, i32, i32
  }
  func.func @transform_8(%arg0: i32, %arg1: i32) -> (i32, i32, i32) {
    %c0_i32 = arith.constant 0 : i32
    %c0_i32_0 = arith.constant 0 : i32
    %c0_i32_1 = arith.constant 0 : i32
    return %arg1, %c0_i32, %c0_i32_0 : i32, i32, i32
  }
  func.func @transform_9(%arg0: i32, %arg1: i32) -> (i32, i32, i32) {
    %c0_i32 = arith.constant 0 : i32
    %c0_i32_0 = arith.constant 0 : i32
    %c0_i32_1 = arith.constant 0 : i32
    return %arg1, %c0_i32, %c0_i32_0 : i32, i32, i32
  }
  func.func @transform_10(%arg0: i32, %arg1: i32) -> (i32, i32, i32) {
    %c0_i32 = arith.constant 0 : i32
    %c0_i32_0 = arith.constant 0 : i32
    %c0_i32_1 = arith.constant 0 : i32
    return %arg1, %c0_i32, %c0_i32_0 : i32, i32, i32
  }
  func.func @transform_11(%arg0: i32, %arg1: i32) -> (i32, i32, i32) {
    %c0_i32 = arith.constant 0 : i32
    %c0_i32_0 = arith.constant 0 : i32
    %c0_i32_1 = arith.constant 0 : i32
    return %arg1, %c0_i32, %c0_i32_0 : i32, i32, i32
  }
  func.func @transform_12(%arg0: i32, %arg1: i32) -> (i32, i32, i32) {
    %c0_i32 = arith.constant 0 : i32
    %c0_i32_0 = arith.constant 0 : i32
    %c0_i32_1 = arith.constant 0 : i32
    return %arg1, %c0_i32, %c0_i32_0 : i32, i32, i32
  }
  func.func @transform_13(%arg0: i32, %arg1: i32) -> (i32, i32, i32) {
    %c0_i32 = arith.constant 0 : i32
    %c0_i32_0 = arith.constant 0 : i32
    %c0_i32_1 = arith.constant 0 : i32
    return %arg0, %c0_i32, %c0_i32_0 : i32, i32, i32
  }
}

</mosaic_0001>

<bundles_post_ra>
// kernel: transformer_encoder.1
= control target key start
LH: loop header
LB: loop body
LE: loop exit
PB: predicated region body
PF: predicated region fallthrough
CT: control target
= control target key end

     0   :  { %s7299_s0 = inlined_call_operand.vmem [shape: f32[2,8,128], index: 0, kind: input, shape index: {}]   ;;  %s7300_s1 = inlined_call_operand.vmem [shape: f32[2,1,128], index: 1, kind: input, shape index: {}]   ;;  %s7301_s2 = inlined_call_operand.vmem [shape: f32[2,1,128], index: 2, kind: input, shape index: {}]   ;;  %s7302_s3 = inlined_call_operand.hbm [shape: bf16[2,128,384], index: 3, kind: input, shape index: {}]   ;;  %s7303_s4 = inlined_call_operand.vmem [shape: f32[2,1,384], index: 4, kind: input, shape index: {}]   ;;  %s7304_s5 = inlined_call_operand.hbm [shape: bf16[2,128,128], index: 5, kind: input, shape index: {}]   ;;  %s7305_s6 = inlined_call_operand.vmem [shape: f32[2,1,128], index: 6, kind: input, shape index: {}]   ;;  %s7306_s7 = inlined_call_operand.vmem [shape: f32[2,1,128], index: 7, kind: input, shape index: {}]   ;;  %s7307_s8 = inlined_call_operand.vmem [shape: f32[2,1,128], index: 8, kind: input, shape index: {}]   ;;  %s7308_s9 = inlined_call_operand.hbm [shape: bf16[2,128,512], index: 9, kind: input, shape index: {}]   ;;  %s7309_s10 = inlined_call_operand.vmem [shape: f32[2,1,512], index: 10, kind: input, shape index: {}]   ;;  %s7310_s11 = inlined_call_operand.hbm [shape: bf16[2,512,128], index: 11, kind: input, shape index: {}]   ;;  %s7311_s12 = inlined_call_operand.vmem [shape: f32[2,1,128], index: 12, kind: input, shape index: {}]   ;;  %s7312_s13 = inlined_call_operand.vmem [shape: f32[2,8,128], index: 13, kind: output, shape index: {}]  }
   0x1   :  { %7323 = sst [smem:[#allocation22_spill]] %s7299_s0 }
   0x2   :  { %7324 = sst [smem:[#allocation23_spill]] %s7302_s3 }
   0x3   :  { %7325 = sst [smem:[#allocation24_spill]] %s7303_s4 }
   0x4   :  { %7326 = sst [smem:[#allocation25_spill]] %s7304_s5 }
   0x5   :  { %7327 = sst [smem:[#allocation26_spill]] %s7305_s6 }
   0x6   :  { %7328 = sst [smem:[#allocation27_spill]] %s7306_s7 }
   0x7   :  { %7329 = sst [smem:[#allocation28_spill]] %s7307_s8 }
   0x8   :  { %7330 = sst [smem:[#allocation29_spill]] %s7308_s9 }
   0x9   :  { %7331 = sst [smem:[#allocation30_spill]] %s7309_s10 }
   0xa   :  { %7332 = sst [smem:[#allocation31_spill]] %s7310_s11 }
   0xb   :  { %7333 = sst [smem:[#allocation32_spill]] %s7311_s12 }
   0xc   :  { %7334 = sst [smem:[#allocation33_spill]] %s7312_s13 }
   0xd   :  { %18 = vsyncpa [#allocation4], 0 }
   0xe   :  { %20 = vsyncpa [#allocation4 + $0x1], 0 }
   0xf   :  { %21 = vsyncpa [#allocation6], 0 }
  0x10   :  { %23 = vsyncpa [#allocation6 + $0x1], 0 }
  0x11   :  { %24 = vsyncpa [#allocation9], 0 }
  0x12   :  { %26 = vsyncpa [#allocation9 + $0x1], 0  ;;  %s6388_s25 = smov 0   ;;  %s6390_s26 = smov 0  }
  0x13   :  { %s6392_s27 = smov 0   ;;  %s6394_s28 = smov 0  }
  0x14   :  { %s6396_s29 = smov 0   ;;  %s6398_s30 = smov 0  }
  0x15   :  { %s6400_s14 = smov 0   ;;  %s6402_s15 = smov 0  }
  0x16 LB: > { %7335 = sst [smem:[#allocation13_spill]] %s6274_s26  ;;  %s7314_s16 = sadd.s32 4294967295, %s6298_s15   ;;  %s6298_s15 = sphi %s6402_s15, %s32_s15   ;;  %s6294_s14 = sphi %s6400_s14, %s7377_s14   ;;  %s6290_s30 = sphi %s6398_s30, %s7376_s30   ;;  %s6286_s29 = sphi %s6396_s29, %s7375_s29   ;;  %s6282_s28 = sphi %s6394_s28, %s7374_s28   ;;  %s6278_s27 = sphi %s6392_s27, %s7373_s27   ;;  %s6274_s26 = sphi %s6390_s26, %s7372_s26   ;;  %s6270_s25 = sphi %s6388_s25, %s7371_s25  }
  0x17   : > { %7336 = sst [smem:[#allocation14_spill]] %s6278_s27  ;;  %s41_s17 = sadd.s32 1, %s6290_s30 }
  0x18   : > { %7337 = sst [smem:[#allocation15_spill]] %s6290_s30  ;;  %p42_p0 = scmp.ge.s32.totalorder %s41_s17, 2 }
  0x19   : > { %7338 = sst [smem:[#allocation16_spill]] %s6294_s14  ;;  %s44_s18 = sadd.s32 1, %s6294_s14 }
  0x1a   : > { %7339 = sst [smem:[#allocation17_spill]] %s6298_s15  ;;  %s129_s19 = sadd.s32 1, %s6278_s27 }
  0x1b   : > { %p136_p1 = scmp.ne.s32.totalorder %s6278_s27, %s6274_s26  ;;  %s7379_s17 = smov (%p42_p0, %s41_s17), 0 }
  0x1c   : > { %7340 = sst [smem:[#allocation18_spill]] %s7379_s17  ;;  %s7381_s18 = smov (!%p42_p0, %s44_s18), %s6294_s14 }
  0x1d   : > { %s126_s20 = ssub.s32 %s6290_s30, %s7379_s17  ;;  %p137_p2 = scmp.eq.s32.totalorder %s6298_s15, 0 }
  0x1e   : > { %p46_p3 = scmp.ge.s32.totalorder %s7381_s18, 2  ;;  %p127_p4 = scmp.eq.s32.totalorder %s126_s20, 0 }
  0x1f   : > { %p138_p5 = por %p137_p2, %p136_p1  ;;  %p142_p6 = scmp.ne.s32.totalorder %s6274_s26, %s6270_s25 }
  0x20   : > { %s7383_s18 = smov (%p46_p3, %s7381_s18), 0  ;;  %p143_p7 = scmp.eq.s32.totalorder %s7314_s16, 0 }
  0x21   : > { %7341 = sst [smem:[#allocation19_spill]] %s7383_s18  ;;  %p5884_p8 = scmp.lt.s32.totalorder %s6298_s15, 4 }
  0x22   : > { %s6442_s21 = scalar_select %p127_p4, %s6278_s27, %s129_s19  }
  0x23   : > { %s6448_s22 = sand.u32 1, %s6278_s27   ;;  %p6450_p9 = por %p143_p7, %p142_p6 }
  0x24   : > { %7342 = sst [smem:[#allocation20_spill]] %s6442_s21  ;;  %s473_s24 = sand.u32 1, %s6298_s15  }
  0x25   : > { %p6455_p10 = pnand %p5884_p8, %p138_p5  ;;  %s5530_s25 = sshll.u32 %s6448_s22, 6 }
  0x26   : > { %s5670_s19 = sshll.u32 %s6290_s30, 10  ;;  %s7345_s5 = sld [smem:[#allocation25_spill]] }
  0x27   : > { %s477_s14 = scalar_lea.vmem [#allocation5], %s5530_s25  ;;  %p5539_p11 = scmp.ge.s32.totalorder %s6298_s15, 1 }
  0x28   : > { %s484_s21 = sshll.u32 %s477_s14, 4  ;;  %s6465_s27 = scalar_lea.sflag [#allocation6], %s473_s24  ;;  %s485_s21 = int_to_ptr.vmem [resolvable:$true] %s484_s21 }
  0x29   : > { %p6114_p12 = pneg %p6455_p10  ;;  %s6125_s13 = scalar_lea.vmem %s485_s21, 1024 }
  0x2a   : > { %p6126_p13 = scmp.ne.s32.totalorder %s485_s21, %s6125_s13  ;;  %s6300_s10 = smov [#allocation5]  }
  0x2b   : > { %s6130_s12 = sshll.u32 %s6300_s10, 4  ;;  %s6131_s12 = int_to_ptr.vmem [resolvable:$false] %s6130_s12 }
  0x2c   : > { %s483_s16 = scalar_lea.hbm %s7345_s5, %s5670_s19  ;;  %p6128_p0 = pnand %p6126_p13, %p6114_p12 }
  0x2d   : > { %s6132_s8 = scalar_lea.vmem %s6131_s12, 2048  ;;  %p6133_p2 = scmp.lt.s32.totalorder %s485_s21, %s6131_s12 }
  0x2e   : > { %p6129_p1 = pneg %p6128_p0  ;;  %p6134_p3 = scmp.lt.s32.totalorder %s6132_s8, %s6125_s13 }
  0x30   : > { %p6135_p4 = por %p6134_p3, %p6133_p2 }
  0x32   : > { %p6136_p5 = pnand %p6135_p4, %p6129_p1 }
  0x34   : > { %6139 = shalt.err (!%p6136_p5)
}
  0x35   : > { %s7317_s14 = smov 64   ;;  %s7318_s17 = smov 4  }
  0x36   : > { %5877 = dma.hbm_to_vmem [thread:$0]  (!%p6455_p10), %s483_s16, 1024, %s485_s21, %s6465_s27, %s7317_s14, %s7317_s14, %s7318_s17  }
  0x37   : > { %p565_p6 = scmp.lt.s32.totalorder %s6298_s15, 5  ;;  %s5859_s10 = smul.u32 192, %s6448_s22 }
  0x38   : > { %s5860_s12 = smul.u32 3072, %s6290_s30  ;;  %s7347_s3 = sld [smem:[#allocation23_spill]] }
  0x39   : > { %p6481_p7 = pnand %p5539_p11, %p565_p6  ;;  %s449_s25 = scalar_lea.vmem [#allocation3], %s5859_s10 }
  0x3a   : > { %s456_s19 = sshll.u32 %s449_s25, 4  ;;  %s5533_s5 = sshll.u32 %s6448_s22, 8  ;;  %s457_s19 = int_to_ptr.vmem [resolvable:$true] %s456_s19 }
  0x3b   : > { %s446_s4 = scalar_lea.sflag [#allocation4], %s6448_s22  ;;  %s6153_s7 = scalar_lea.vmem %s457_s19, 3072 }
  0x3c   : > { %p6154_p8 = scmp.ne.s32.totalorder %s457_s19, %s6153_s7  ;;  %s6303_s16 = smov [#allocation3]  }
  0x3d   : > { %s6158_s21 = sshll.u32 %s6303_s16, 4  ;;  %s6159_s21 = int_to_ptr.vmem [resolvable:$false] %s6158_s21 }
  0x3e   : > { %s455_s24 = scalar_lea.hbm %s7347_s3, %s5860_s12  ;;  %p6156_p13 = pnand %p6154_p8, %p6114_p12 }
  0x3f   : > { %s6160_s14 = scalar_lea.vmem %s6159_s21, 6144  ;;  %p6161_p0 = scmp.lt.s32.totalorder %s457_s19, %s6159_s21 }
  0x40   : > { %p6157_p11 = pneg %p6156_p13  ;;  %p6162_p1 = scmp.lt.s32.totalorder %s6160_s14, %s6153_s7 }
  0x42   : > { %p6163_p2 = por %p6162_p1, %p6161_p0 }
  0x44   : > { %p6164_p3 = pnand %p6163_p2, %p6157_p11 }
  0x46   : > { %6167 = shalt.err (!%p6164_p3)
}
  0x47   : > { %s6304_s10 = smov 192   ;;  %s6305_s12 = smov 12  }
  0x48   : > { %5874 = dma.hbm_to_vmem [thread:$0]  (!%p6455_p10), %s455_s24, 3072, %s457_s19, %s446_s4, %s6304_s10, %s6304_s10, %s6305_s12  }
  0x49   : > { %s5671_s13 = sshll.u32 %s6290_s30, 12  ;;  %s7348_s9 = sld [smem:[#allocation29_spill]] }
  0x4a   : > { %s516_s17 = scalar_lea.vmem [#allocation7], %s5533_s5  ;;  %s6306_s14 = smov [#allocation7]  }
  0x4b   : > { %s523_s21 = sshll.u32 %s516_s17, 4  ;;  %s6186_s3 = sshll.u32 %s6306_s14, 4  ;;  %s524_s21 = int_to_ptr.vmem [resolvable:$true] %s523_s21  ;;  %s6187_s3 = int_to_ptr.vmem [resolvable:$false] %s6186_s3 }
  0x4c   : > { %s6181_s7 = scalar_lea.vmem %s524_s21, 4096  ;;  %s6188_s6 = scalar_lea.vmem %s6187_s3, 8192 }
  0x4d   : > { %p6182_p4 = scmp.ne.s32.totalorder %s524_s21, %s6181_s7  ;;  %p6189_p8 = scmp.lt.s32.totalorder %s524_s21, %s6187_s3 }
  0x4e   : > { %p6190_p13 = scmp.lt.s32.totalorder %s6188_s6, %s6181_s7 }
  0x4f   : > { %s522_s16 = scalar_lea.hbm %s7348_s9, %s5671_s13  ;;  %p6184_p5 = pnand %p6182_p4, %p6114_p12 }
  0x50   : > { %p6191_p11 = por %p6190_p13, %p6189_p8 }
  0x51   : > { %p6185_p6 = pneg %p6184_p5 }
  0x53   : > { %p6192_p0 = pnand %p6191_p11, %p6185_p6 }
  0x55   : > { %6195 = shalt.err (!%p6192_p0)
}
  0x56   : > { %s6307_s4 = smov 256   ;;  %s6308_s17 = smov 16  }
  0x57   : > { %5880 = dma.hbm_to_vmem [thread:$0]  (!%p6455_p10), %s522_s16, 4096, %s524_s21, %s6465_s27, %s6307_s4, %s6307_s4, %s6308_s17  }
  0x58   : > { %s7349_s11 = sld [smem:[#allocation31_spill]]  ;;  %s544_s12 = scalar_lea.vmem [#allocation8], %s5533_s5 }
  0x59   : > { %s551_s3 = sshll.u32 %s544_s12, 4  ;;  %s541_s6 = scalar_lea.sflag [#allocation9], %s6448_s22  ;;  %s552_s3 = int_to_ptr.vmem [resolvable:$true] %s551_s3 }
  0x5a   : > { %s6209_s18 = scalar_lea.vmem %s552_s3, 4096  ;;  %s6309_s25 = smov [#allocation8]  }
  0x5b   : > { %p6210_p1 = scmp.ne.s32.totalorder %s552_s3, %s6209_s18  ;;  %s6214_s7 = sshll.u32 %s6309_s25, 4  ;;  %s6215_s7 = int_to_ptr.vmem [resolvable:$false] %s6214_s7 }
  0x5c   : > { %s6216_s14 = scalar_lea.vmem %s6215_s7, 8192  ;;  %p6217_p4 = scmp.lt.s32.totalorder %s552_s3, %s6215_s7 }
  0x5d   : > { %p6212_p2 = pnand %p6210_p1, %p6114_p12  ;;  %p6218_p5 = scmp.lt.s32.totalorder %s6216_s14, %s6209_s18 }
  0x5e   : > { %s550_s10 = scalar_lea.hbm %s7349_s11, %s5671_s13 }
  0x5f   : > { %p6213_p3 = pneg %p6212_p2  ;;  %p6219_p6 = por %p6218_p5, %p6217_p4 }
  0x61   : > { %p6220_p8 = pnand %p6219_p6, %p6213_p3 }
  0x63   : > { %6223 = shalt.err (!%p6220_p8)
}
  0x64   : > { %s7350_s5 = smov 4   ;;  %s7351_s27 = smov 64  }
  0x65   : > { %5883 = dma.hbm_to_vmem [thread:$0]  (!%p6455_p10), %s550_s10, 4096, %s552_s3, %s541_s6, %s7351_s27, %s7351_s27, %s7350_s5  }
  0x66   : > { %569 = sbr.rel (%p6481_p7) target bundleno = 3097 (0xc19), region = 72 }
  0x6b   : > { %s571_s22 = sand.u32 1, %s6274_s26  }
  0x6c   : > { %s5861_s13 = smul.u32 192, %s571_s22  ;;  %s572_s16 = scalar_lea.sflag [#allocation4], %s571_s22 }
  0x6e   : > { %s6526_s21 = scalar_lea.vmem [#allocation3], %s5861_s13 }
  0x6f   : > { %6257 = dma.done.wait (%p6450_p9), %s572_s16, 3072  }
  0x70   : > { %6259 = vsyncadd (%p6450_p9), %s572_s16, 4294964224  ;;  %s7352_s20 = sadd.s32 4294967295, %s6298_s15   ;;  %s5540_s17 = sshll.u32 %s571_s22, 6 }
  0x71   : > { %s580_s4 = sand.u32 1, %s7352_s20   ;;  %s6534_s8 = scalar_lea.vmem [#allocation5], %s5540_s17 }
  0x72   : > { %s581_s24 = scalar_lea.sflag [#allocation6], %s580_s4 }
  0x73   : > { %6261 = dma.done.wait (%p6450_p9), %s581_s24, 5120  }
  0x74   : > { %6263 = vsyncadd (%p6450_p9), %s581_s24, 4294962176  ;;  %s5541_s19 = sshll.u32 %s571_s22, 8  ;;  %s599_s12 = scalar_lea.sflag [#allocation9], %s571_s22 }
  0x75   : > { %s6540_s10 = scalar_lea.vmem [#allocation7], %s5541_s19  ;;  %s6542_s3 = scalar_lea.vmem [#allocation8], %s5541_s19 }
  0x76   : > { %7353 = sst [smem:[#allocation21_spill]] %s6542_s3 }
  0x77   : > { %6265 = dma.done.wait (%p6450_p9), %s599_s12, 4096  }
  0x78   : > { %6267 = vsyncadd (%p6450_p9), %s599_s12, 4294963200  ;;  %p689_p10 = scmp.lt.s32.totalorder %s6286_s29, 1  ;;  %p693_p12 = scmp.lt.s32.totalorder %s6282_s28, 1 }
  0x79   : > { %s7354_s0 = sld [smem:[#allocation22_spill]]  ;;  %p5546_p9 = scmp.ne.s32.totalorder %s6282_s28, 0 }
  0x7a   : > { %s7385_s29 = smov (!%p689_p10, %s6286_s29), 1  ;;  %s7357_s25 = sld [smem:[#allocation24_spill]] }
  0x7b   : > { %s6552_s6 = scalar_select %p693_p12, %s6282_s28, 1 }
  0x7c   : > { %s5543_s18 = sshll.u32 %s7385_s29, 3  ;;  %s7356_s29 = sld [smem:[#allocation27_spill]] }
  0x7d   : > { %s5862_s20 = smul.u32 3, %s6552_s6  ;;  %s7358_s27 = sld [smem:[#allocation28_spill]] }
  0x7e   : > { %s5544_s22 = sshll.u32 %s6552_s6, 2  ;;  %s7359_s15 = sld [smem:[#allocation32_spill]] }
  0x7f   : > { %s692_s7 = scalar_lea.vmem %s7354_s0, %s5543_s18  ;;  %s7360_s24 = sld [smem:[#allocation30_spill]] }
  0x80   : > { %s6577_s0 = scalar_lea.vmem %s7357_s25, %s5862_s20 }
  0x82   : > { %s708_s11 = scalar_lea.vmem %s7356_s29, %s6552_s6  ;;  %s7361_s29 = sld [smem:[#allocation33_spill]] }
  0x83   : > { %s711_s26 = scalar_lea.vmem %s7358_s27, %s6552_s6 }
  0x84   : > { %s718_s3 = scalar_lea.vmem %s7359_s15, %s6552_s6  ;;  %727 = sbr.rel (%p5546_p9) target bundleno = 139 (0x8b), region = 92 }
  0x85   : > { %s6591_s19 = scalar_lea.vmem %s7360_s24, %s5544_s22 }
  0x88   : > { %s6596_s30 = scalar_lea.vmem %s7361_s29, %s5543_s18 }
  0x89   : > { %v728_v0 = vld [vmem:[%s692_s7] sm:$0xff] }
  0x8a   : > { %729 = vst [vmem:[#allocation2] sm:$0xff] %v728_v0 }
  0x8b PF: > { %v5963_v2 = vld [vmem:[%s6526_s21 + $0xac] ss:$12 sps:$4 sm:$0xff]   ;;  %v5965_v3 = vld [vmem:[%s6526_s21 + $0xa8] ss:$12 sps:$4 sm:$0xff]   ;;  %v6310_v4 = vmov 0.0   ;;  %v6311_v23 = vmov 0   ;;  %s7362_s7 = scalar_lea.vmem %s7300_s1, %s6552_s6  ;;  %s7363_s16 = scalar_lea.vmem %s7301_s2, %s6552_s6  ;;  %v794_v42 = vlaneseq }
  0x8c   : > { %5759 = vmatprep.subr.bf16.mxu1 %v6310_v4  ;;  %v5966_v5 = vld [vmem:[%s6526_s21 + $0xb0] ss:$12 sps:$4 sm:$0xff]   ;;  %v5967_v6 = vld [vmem:[%s6526_s21 + $0x94] ss:$12 sps:$4 sm:$0xff]   ;;  %937 = vmatprep.subr.bf16.mxu0 %v5963_v2  ;;  %v5970_v8 = vld [vmem:[%s6526_s21 + $0x98] ss:$12 sps:$4 sm:$0xff]  }
  0x8d   : > { %v5969_v7 = vld [vmem:[%s6526_s21 + $0x90] ss:$12 sps:$4 sm:$0xff]   ;;  %938 = vmatpush1.bf16.msra.mxu0 %v5965_v3  ;;  %5760 = vmatpush3.bf16.msra.mxu1 %v5966_v5  ;;  %v5973_v14 = vld [vmem:[%s6526_s21 + $0x78] ss:$12 sps:$4 sm:$0xff]   ;;  %v5974_v15 = vld [vmem:[%s6526_s21 + $0x80] ss:$12 sps:$4 sm:$0xff]  }
  0x8e   : > { %939 = vmatprep.subr.bf16.mxu0 %v5967_v6  ;;  %5761 = vmatprep.subr.bf16.mxu1 %v6310_v4  ;;  %v5971_v13 = vld [vmem:[%s6526_s21 + $0x7c] ss:$12 sps:$4 sm:$0xff]   ;;  %v5975_v16 = vld [vmem:[%s6526_s21 + $0x64] ss:$12 sps:$4 sm:$0xff]   ;;  %v5977_v17 = vld [vmem:[%s6526_s21 + $0x60] ss:$12 sps:$4 sm:$0xff]  }
  0x8f   : > { %v5978_v18 = vld [vmem:[%s6526_s21 + $0x68] ss:$12 sps:$4 sm:$0xff]   ;;  %v5979_v19 = vld [vmem:[%s6526_s21 + $0x4c] ss:$12 sps:$4 sm:$0xff]   ;;  %v5982_v21 = vld [vmem:[%s6526_s21 + $0x50] ss:$12 sps:$4 sm:$0xff]   ;;  %969 = vmatprep.mubr.bf16.mxu0 %v6311_v23 }
  0x90   : > { %v5981_v20 = vld [vmem:[%s6526_s21 + $0x48] ss:$12 sps:$4 sm:$0xff]   ;;  %vm6312_vm0 = vmmov 0   ;;  %v5985_v24 = vld [vmem:[%s6526_s21 + $0x30] ss:$12 sps:$4 sm:$0xff]   ;;  %v6647_v43 = vshrl.u32 %v794_v42, 7 }
  0x91   : > { %v730_v1 = vld [vmem:[#allocation2] sm:$0xff]  ;;  %940 = vmatpush1.bf16.msra.mxu0 %v5969_v7  ;;  %5762 = vmatpush3.bf16.msra.mxu1 %v5970_v8  ;;  %v5983_v22 = vld [vmem:[%s6526_s21 + $0x34] ss:$12 sps:$4 sm:$0xff]   ;;  %v5991_v29 = vld [vmem:[%s6526_s21 + $0x4] ss:$12 sps:$4 sm:$0xff]   ;;  %s6314_s20 = smov 96  }
  0x92   : > { %733 = vadd.xlane.f32.xlu0 %v730_v1  ;;  %5763 = vmatprep.subr.bf16.mxu1 %v6310_v4  ;;  %v5986_v25 = vld [vmem:[%s6526_s21 + $0x38] ss:$12 sps:$4 sm:$0xff]   ;;  %v5987_v26 = vld [vmem:[%s6526_s21 + $0x1c] ss:$12 sps:$4 sm:$0xff]   ;;  %v5990_v28 = vld [vmem:[%s6526_s21 + $0x20] ss:$12 sps:$4 sm:$0xff]  }
  0x93   : > { %941 = vmatprep.subr.bf16.mxu0 %v5971_v13  ;;  %5775 = vmatprep.mubr.msk.bf16.mxu1 %vm6312_vm0, %v6310_v4  ;;  %v5989_v27 = vld [vmem:[%s6526_s21 + $0x18] ss:$12 sps:$4 sm:$0xff]   ;;  %v5993_v30 = vld [vmem:[%s6526_s21] ss:$12 sps:$4 sm:$0xff]   ;;  %v5994_v31 = vld [vmem:[%s6526_s21 + $0x8] ss:$12 sps:$4 sm:$0xff]  }
  0x94   : > { %v5547_v36 = vld [vmem:[%s7362_s7] ss:$0 sm:$0xff]  ;;  %v800_v44 = vsub.s32 1, %v6647_v43  ;;  %v796_v46 = vsub.s32 0, %v6647_v43  ;;  %s6315_s23 = smov 64   ;;  %vm2546_vm1 = vcmask 261120  }
  0x95   : > { %942 = vmatpush1.bf16.msra.mxu0 %v5973_v14  ;;  %5764 = vmatpush3.bf16.msra.mxu1 %v5974_v15  ;;  %v5548_v38 = vld [vmem:[%s7363_s16] ss:$0 sm:$0xff]  ;;  %v6316_v59 = vmov 1983009808   ;;  %v6317_v61 = vmov 1934713408  }
  0x96   : > { %5765 = vmatprep.subr.bf16.mxu1 %v6310_v4  ;;  %943 = vmatprep.subr.bf16.mxu0 %v5975_v16  ;;  %v6651_v45 = vld [vmem:[%s6577_s0] sm:$0x7]  ;;  %s6313_s0 = smov 32   ;;  %v1031_v60 = vunpack.c.l.s4 %v6316_v59  ;;  %v1063_v62 = vunpack.c.l.s4 %v6317_v61  ;;  %vm2719_vm2 = vcmask 64512   ;;  %vm4477_vm3 = vcmask 523264   ;;  %s7364_s14 = sld [smem:[#allocation26_spill]] }
  0x97   : > { %v801_v47 = vrot.slane %v6651_v45, %v800_v44  ;;  %v797_v52 = vrot.slane %v6651_v45, %v796_v46  ;;  %vm4479_vm4 = vcmask 785408   ;;  %s7366_s22 = sld [smem:[#allocation21_spill]]  ;;  %p5667_p7 = scmp.ne.s32.totalorder %s6282_s28, 1 }
  0x98   : > { %v1032_v63 = vunpack.c.0.s8 %v1031_v60  ;;  %v1064_v2 = vunpack.c.0.s8 %v1063_v62 }
  0x99   : > { %944 = vmatpush1.bf16.msra.mxu0 %v5977_v17  ;;  %5766 = vmatpush3.bf16.msra.mxu1 %v5978_v18 }
  0x9a   : > { %945 = vmatprep.subr.bf16.mxu0 %v5979_v19  ;;  %5767 = vmatprep.subr.bf16.mxu1 %v6310_v4  ;;  %v6674_v3 = vsub.s32 %v1032_v63, %v6647_v43 }
  0x9c   : > { %s7365_s5 = scalar_lea.vmem %s7364_s14, %s6552_s6 }
  0x9d   : > { %946 = vmatpush1.bf16.msra.mxu0 %v5981_v20  ;;  %5768 = vmatpush3.bf16.msra.mxu1 %v5982_v21 }
  0x9e   : > { %947 = vmatprep.subr.bf16.mxu0 %v5983_v22  ;;  %5769 = vmatprep.subr.bf16.mxu1 %v6310_v4 }
  0xa1   : > { %948 = vmatpush1.bf16.msra.mxu0 %v5985_v24  ;;  %5770 = vmatpush3.bf16.msra.mxu1 %v5986_v25 }
  0xa2   : > { %949 = vmatprep.subr.bf16.mxu0 %v5987_v26  ;;  %5771 = vmatprep.subr.bf16.mxu1 %v6310_v4 }
  0xa5   : > { %950 = vmatpush1.bf16.msra.mxu0 %v5989_v27  ;;  %5772 = vmatpush3.bf16.msra.mxu1 %v5990_v28 }
  0xa6   : > { %951 = vmatprep.subr.bf16.mxu0 %v5991_v29  ;;  %5773 = vmatprep.subr.bf16.mxu1 %v6310_v4 }
  0xa9   : > { %952 = vmatpush1.bf16.msra.mxu0 %v5993_v30  ;;  %5774 = vmatpush3.bf16.msra.mxu1 %v5994_v31 }
  0xaa   : > { %5779 = vmatprep.subr.bf16.mxu1 %v6310_v4 }
 0x11b   : > { %v734_v9 = vpop.xlane.xlu0 %733 }
 0x11c   : > { %v736_v10 = vmul.f32 0.0078125, %v734_v9 }
 0x11e   : > { %v737_v11 = vsub.f32 %v730_v1, %v736_v10  ;;  %v6677_v10 = vsub.s32 %v1064_v2, %v6647_v43 }
 0x120   : > { %v738_v12 = vmul.f32 %v737_v11, %v737_v11 }
 0x122   : > { %739 = vadd.xlane.f32.xlu0 %v738_v12 }
 0x1ab   : > { %v740_v32 = vpop.xlane.xlu0 %739 }
 0x1ac   : > { %v741_v33 = vmul.f32 0.0078125, %v740_v32 }
 0x1ae   : > { %v742_v34 = vadd.f32 1e-05, %v741_v33 }
 0x1b0   : > { %6083 = vrsqrt.f32 %v742_v34 }
 0x1bd   : > { %v6084_v35 = vpop.eup %6083 }
 0x1be   : > { %v744_v37 = vmul.f32 %v6084_v35, %v737_v11 }
 0x1c0   : > { %v751_v39 = vmul.f32 %v5547_v36, %v744_v37 }
 0x1c2   : > { %v758_v40 = vadd.f32 %v5548_v38, %v751_v39 }
 0x1c4   : > { %v759_v41 = vpack.c.bf16 %v758_v40, %v758_v40 }
 0x1c6   : > { %970 = vmatmul.mubr.bf16.vlgmr.msra.gmra.mxu0 %v759_v41  ;;  %5776 = vmatmul.mubr.bf16.vlgmr.msra.gmra.mxu1 %v759_v41 }
 0x1c7   : > { %5783 = vmatprep.mubr.msk.bf16.mxu1 %vm6312_vm0, %v6310_v4 }
 0x286   : > { %v971_v48 = vpop.f32.mrf.mxu0  ;;  %v6657_v49 = vpop.f32.mrf.mxu1 }
 0x287   : > { %v6664_v58 = vadd.f32 %v971_v48, %v797_v52 }
 0x288   : > { %v973_v50 = vpop.f32.mrf.mxu0  ;;  %v5777_v51 = vpop.f32.mrf.mxu1 }
 0x289   : > { %v974_v53 = vadd.f32 %v973_v50, %v801_v47 }
 0x28a   : > { %v975_v54 = vpop.f32.mrf.mxu0  ;;  %v1015_v55 = vpop.f32.mrf.mxu1 }
 0x28b   : > { %1111 = vrot.lane.b32.xlu0 %v974_v53, %s6313_s0  ;;  %1105 = vrot.lane.b32.xlu1 %v974_v53, %s6314_s20 }
 0x28c   : > { %v976_v56 = vpop.f32.mrf.mxu0  ;;  %v5778_v57 = vpop.f32.mrf.mxu1 }
 0x28f   : > { %1108 = vrot.lane.b32.xlu1 %v974_v53, %s6315_s23  ;;  %1019 = vrot.lane.b32.xlu0 %v6664_v58, %s6314_s20 }
 0x293   : > { %1022 = vrot.lane.b32.xlu1 %v6664_v58, %s6315_s23 }
 0x297   : > { %1025 = vrot.lane.b32.xlu1 %v6664_v58, %s6313_s0 }
 0x2fd   : > { %v1112_v0 = vpop.permute.xlu0 %1111  ;;  %v1106_v1 = vpop.permute.xlu1 %1105 }
 0x2fe   : > { %v1130_v5 = vcombine.low %v1106_v1, %v1112_v0  ;;  %v1131_v6 = vcombine.high %v1106_v1, %v1112_v0 }
 0x300   : > { %v1138_v11 = vrot.slane %v1130_v5, %v6674_v3  ;;  %v1145_v12 = vrot.slane %v1131_v6, %v6674_v3 }
 0x301   : > { %v1109_v7 = vpop.permute.xlu1 %1108  ;;  %v6699_v47 = vpop.permute.xlu0 %1019 }
 0x302   : > { %v1114_v8 = vcombine.low %v974_v53, %v1109_v7  ;;  %v1115_v9 = vcombine.high %v974_v53, %v1109_v7 }
 0x304   : > { %v1122_v13 = vrot.slane %v1114_v8, %v6674_v3  ;;  %v1129_v14 = vrot.slane %v1115_v9, %v6674_v3 }
 0x305   : > { %v6691_v36 = vpop.permute.xlu1 %1022 }
 0x306   : > { %v1146_v15 = vcombine.low %v1122_v13, %v1138_v11  ;;  %v1163_v16 = vcombine.high %v1129_v14, %v1145_v12  ;;  %v1147_v17 = vcombine.high %v1122_v13, %v1138_v11  ;;  %v1162_v25 = vcombine.low %v1129_v14, %v1145_v12 }
 0x308   : > { %v1154_v18 = vrot.slane %v1146_v15, %v6677_v10  ;;  %v1177_v19 = vrot.slane %v1163_v16, %v6677_v10  ;;  %v1161_v22 = vrot.slane %v1147_v17, %v6677_v10  ;;  %v1170_v28 = vrot.slane %v1162_v25, %v6677_v10 }
 0x309   : > { %v6693_v37 = vpop.permute.xlu1 %1025 }
 0x30a   : > { %v1182_v20 = vpack.c.bf16 %v1154_v18, %v1154_v18  ;;  %v1188_v21 = vpack.c.bf16 %v1177_v19, %v1177_v19  ;;  %v1178_v24 = vcombine.high %v1154_v18, %v6310_v4  ;;  %v1184_v26 = vpack.c.bf16 %v1161_v22, %v1161_v22 }
 0x30b   : > { %v1186_v29 = vpack.c.bf16 %v1170_v28, %v1170_v28  ;;  %v1179_v30 = vcombine.high %v1161_v22, %v6310_v4  ;;  %v1180_v32 = vcombine.high %v1170_v28, %v6310_v4  ;;  %v1181_v34 = vcombine.high %v1177_v19, %v6310_v4 }
 0x30c   : > { %1338 = vxpose.xlu1.c.b16.start.end [1/1] (short) (narrow) %v1182_v20, 32  ;;  %1434 = vxpose.xlu0.c.b16.start.end [1/1] (short) (narrow) %v1188_v21, 32  ;;  %v1183_v27 = vpack.c.bf16 %v1178_v24, %v1178_v24 }
 0x30d   : > { %v1185_v31 = vpack.c.bf16 %v1179_v30, %v1179_v30  ;;  %v1187_v33 = vpack.c.bf16 %v1180_v32, %v1180_v32  ;;  %v1189_v35 = vpack.c.bf16 %v1181_v34, %v1181_v34 }
 0x311   : > { %1370 = vxpose.xlu1.c.b16.start.end [1/1] (short) (narrow) %v1184_v26, 32  ;;  %1354 = vxpose.xlu0.c.b16.start.end [1/1] (short) (narrow) %v1183_v27, 32 }
 0x316   : > { %1402 = vxpose.xlu1.c.b16.start.end [1/1] (short) (narrow) %v1186_v29, 32 }
 0x31b   : > { %1386 = vxpose.xlu1.c.b16.start.end [1/1] (short) (narrow) %v1185_v31, 32 }
 0x320   : > { %1418 = vxpose.xlu1.c.b16.start.end [1/1] (short) (narrow) %v1187_v33, 32 }
 0x325   : > { %1450 = vxpose.xlu1.c.b16.start.end [1/1] (short) (narrow) %v1189_v35, 32 }
 0x36e   : > { %v1346_v38 = vpop.trf.xlu1  ;;  %v1442_v50 = vpop.trf.xlu0 }
 0x36f   : > { %v1470_v0 = vshrl.u32 %v1346_v38, 16  ;;  %v1494_v1 = vshrl.u32 %v1442_v50, 16 }
 0x372   : > { %v6695_v39 = vpop.trf.xlu1  ;;  %v6705_v53 = vpop.trf.xlu0 }
 0x376   : > { %v1378_v40 = vpop.trf.xlu1  ;;  %v1362_v55 = vpop.trf.xlu0 }
 0x377   : > { %v1471_v60 = vshrl.u32 %v1362_v55, 16  ;;  %v1468_v62 = vpack.i.b16 %v1362_v55, %v1346_v38  ;;  %v1478_v2 = vshrl.u32 %v1378_v40, 16 }
 0x379   : > { %v1472_v12 = vpack.i.b16 %v1471_v60, %v1470_v0 }
 0x37a   : > { %v6697_v41 = vpop.trf.xlu1 }
 0x37e   : > { %v1410_v42 = vpop.trf.xlu1 }
 0x37f   : > { %v1486_v61 = vshrl.u32 %v1410_v42, 16 }
 0x382   : > { %v6701_v48 = vpop.trf.xlu1 }
 0x386   : > { %v1394_v51 = vpop.trf.xlu1 }
 0x387   : > { %v1479_v63 = vshrl.u32 %v1394_v51, 16  ;;  %v1476_v7 = vpack.i.b16 %v1394_v51, %v1378_v40 }
 0x389   : > { %v1480_v13 = vpack.i.b16 %v1479_v63, %v1478_v2 }
 0x38a   : > { %v6703_v52 = vpop.trf.xlu1 }
 0x38e   : > { %v1426_v54 = vpop.trf.xlu1 }
 0x38f   : > { %v1487_v56 = vshrl.u32 %v1426_v54, 16  ;;  %v1484_v59 = vpack.i.b16 %v1426_v54, %v1410_v42  ;;  %v1363_v42 = vpop.trf.xlu0  ;;  %v1508_v54 = vpack.i.b16 %v6703_v52, %v6697_v41 }
 0x391   : > { %v1488_v5 = vpack.i.b16 %v1487_v56, %v1486_v61  ;;  %v1530_v8 = vcombine.low %v1468_v62, %v1484_v59  ;;  %v1531_v21 = vcombine.high %v1468_v62, %v1484_v59  ;;  %v1500_v59 = vpack.i.b16 %v1363_v42, %v6695_v39 }
 0x392   : > { %v6707_v57 = vpop.trf.xlu1 }
 0x393   : > { %v1598_v16 = vcombine.low %v1472_v12, %v1488_v5  ;;  %v1538_v18 = vrot.slane %v1530_v8, %v6674_v3  ;;  %v1599_v32 = vcombine.high %v1472_v12, %v1488_v5  ;;  %v1545_v33 = vrot.slane %v1531_v21, %v6674_v3 }
 0x394   : > { %v1516_v55 = vpack.i.b16 %v6707_v57, %v6701_v48 }
 0x395   : > { %v1606_v24 = vrot.slane %v1598_v16, %v6674_v3  ;;  %v1613_v56 = vrot.slane %v1599_v32, %v6674_v3 }
 0x396   : > { %v1458_v6 = vpop.trf.xlu1  ;;  %v1667_v21 = vcombine.high %v1500_v59, %v1516_v55 }
 0x397   : > { %v1492_v9 = vpack.i.b16 %v1458_v6, %v1442_v50  ;;  %v1495_v11 = vshrl.u32 %v1458_v6, 16 }
 0x399   : > { %v1496_v14 = vpack.i.b16 %v1495_v11, %v1494_v1  ;;  %v1546_v15 = vcombine.low %v1476_v7, %v1492_v9  ;;  %v1547_v17 = vcombine.high %v1476_v7, %v1492_v9  ;;  %v1666_v1 = vcombine.low %v1500_v59, %v1516_v55 }
 0x39a   : > { %v1459_v27 = vpop.trf.xlu1 }
 0x39b   : > { %v1554_v19 = vrot.slane %v1546_v15, %v6674_v3  ;;  %v1614_v20 = vcombine.low %v1480_v13, %v1496_v14  ;;  %v1615_v26 = vcombine.high %v1480_v13, %v1496_v14  ;;  %v1561_v30 = vrot.slane %v1547_v17, %v6674_v3 }
 0x39c   : > { %v1524_v34 = vpack.i.b16 %v1459_v27, %v6705_v53  ;;  %v1674_v8 = vrot.slane %v1666_v1, %v6674_v3  ;;  %v1527_v13 = vshrl.u32 %v1459_v27, 16  ;;  %v1526_v17 = vshrl.u32 %v6705_v53, 16 }
 0x39d   : > { %v1562_v22 = vcombine.low %v1538_v18, %v1554_v19  ;;  %v1622_v25 = vrot.slane %v1614_v20, %v6674_v3  ;;  %v1563_v29 = vcombine.high %v1538_v18, %v1554_v19  ;;  %v1629_v40 = vrot.slane %v1615_v26, %v6674_v3 }
 0x39e   : > { %v1578_v51 = vcombine.low %v1545_v33, %v1561_v30  ;;  %v1682_v60 = vcombine.low %v1508_v54, %v1524_v34  ;;  %v1579_v0 = vcombine.high %v1545_v33, %v1561_v30  ;;  %v1683_v15 = vcombine.high %v1508_v54, %v1524_v34 }
 0x39f   : > { %v1570_v28 = vrot.slane %v1562_v22, %v6677_v10  ;;  %v1630_v31 = vcombine.low %v1606_v24, %v1622_v25  ;;  %v1631_v38 = vcombine.high %v1606_v24, %v1622_v25  ;;  %v1577_v50 = vrot.slane %v1563_v29, %v6677_v10 }
 0x3a0   : > { %v1646_v62 = vcombine.low %v1613_v56, %v1629_v40  ;;  %v1586_v63 = vrot.slane %v1578_v51, %v6677_v10  ;;  %v1647_v5 = vcombine.high %v1613_v56, %v1629_v40  ;;  %v1690_v6 = vrot.slane %v1682_v60, %v6674_v3 }
 0x3a1   : > { %1802 = vxpose.xlu1.c.b16.start.end [1/1] (short) (narrow) %v1570_v28, 16  ;;  %v1638_v35 = vrot.slane %v1630_v31, %v6677_v10  ;;  %v1645_v61 = vrot.slane %v1631_v38, %v6677_v10  ;;  %v6731_v7 = vrot.slane %v1579_v0, %v6677_v10  ;;  %v1594_v12 = vcombine.high %v1570_v28, %v6311_v23 }
 0x3a2   : > { %v1654_v2 = vrot.slane %v1646_v62, %v6677_v10  ;;  %v6736_v9 = vrot.slane %v1647_v5, %v6677_v10  ;;  %v1698_v11 = vcombine.low %v1674_v8, %v1690_v6  ;;  %v1595_v16 = vcombine.high %v1577_v50, %v6311_v23 }
 0x3a3   : > { %1818 = vxpose.xlu0.c.b16.start.end [1/1] (short) (narrow) %v1638_v35, 16  ;;  %v1511_v18 = vshrl.u32 %v6703_v52, 16  ;;  %v1519_v19 = vshrl.u32 %v6707_v57, 16  ;;  %v1510_v20 = vshrl.u32 %v6697_v41, 16  ;;  %v1503_v22 = vshrl.u32 %v1363_v42, 16 }
 0x3a4   : > { %v1706_v14 = vrot.slane %v1698_v11, %v6677_v10  ;;  %v1518_v24 = vshrl.u32 %v6701_v48, 16  ;;  %v1528_v25 = vpack.i.b16 %v1527_v13, %v1526_v17  ;;  %v1662_v26 = vcombine.high %v1638_v35, %v6311_v23 }
 0x3a5   : > { %1866 = vxpose.xlu1.c.b16.start.end [1/1] (short) (narrow) %v1577_v50, 16  ;;  %v1596_v27 = vcombine.high %v1586_v63, %v6311_v23  ;;  %v1699_v28 = vcombine.high %v1674_v8, %v1690_v6  ;;  %v1697_v53 = vrot.slane %v1683_v15, %v6674_v3  ;;  %v1502_v52 = vshrl.u32 %v6695_v39, 16 }
 0x3a6   : > { %v1512_v29 = vpack.i.b16 %v1511_v18, %v1510_v20  ;;  %v1520_v57 = vpack.i.b16 %v1519_v19, %v1518_v24  ;;  %v1681_v41 = vrot.slane %v1667_v21, %v6674_v3  ;;  %v1663_v31 = vcombine.high %v1645_v61, %v6311_v23 }
 0x3a7   : > { %1882 = vxpose.xlu0.c.b16.start.end [1/1] (short) (narrow) %v1645_v61, 16  ;;  %v1504_v30 = vpack.i.b16 %v1503_v22, %v1502_v52  ;;  %v1713_v32 = vrot.slane %v1699_v28, %v6677_v10  ;;  %v1664_v35 = vcombine.high %v1654_v2, %v6311_v23  ;;  %v1730_v54 = vcombine.high %v1706_v14, %v6311_v23 }
 0x3a8   : > { %v1750_v48 = vcombine.low %v1512_v29, %v1528_v25  ;;  %v1714_v33 = vcombine.low %v1681_v41, %v1697_v53  ;;  %v1751_v38 = vcombine.high %v1512_v29, %v1528_v25  ;;  %v1715_v42 = vcombine.high %v1681_v41, %v1697_v53 }
 0x3a9   : > { %1930 = vxpose.xlu1.c.b16.start.end [1/1] (short) (narrow) %v1586_v63, 16  ;;  %v1734_v34 = vcombine.low %v1504_v30, %v1520_v57  ;;  %v1735_v51 = vcombine.high %v1504_v30, %v1520_v57  ;;  %v1731_v5 = vcombine.high %v1713_v32, %v6311_v23 }
 0x3aa   : > { %v1758_v39 = vrot.slane %v1750_v48, %v6674_v3  ;;  %v1722_v40 = vrot.slane %v1714_v33, %v6677_v10  ;;  %v1765_v56 = vrot.slane %v1751_v38, %v6674_v3  ;;  %v1729_v59 = vrot.slane %v1715_v42, %v6677_v10 }
 0x3ab   : > { %1946 = vxpose.xlu0.c.b16.start.end [1/1] (short) (narrow) %v1654_v2, 16  ;;  %v1742_v50 = vrot.slane %v1734_v34, %v6674_v3  ;;  %v1749_v61 = vrot.slane %v1735_v51, %v6674_v3  ;;  %v1044_v34 = vcombine.low %v6699_v47, %v6693_v37  ;;  %v1029_v38 = vcombine.high %v6664_v58, %v6691_v36 }
 0x3ac   : > { %v1732_v8 = vcombine.high %v1722_v40, %v6311_v23  ;;  %v1733_v13 = vcombine.high %v1729_v59, %v6311_v23 }
 0x3ad   : > { %1994 = vxpose.xlu1.c.b16.start.end [1/1] (short) (narrow) %v6731_v7, 16  ;;  %v1767_v55 = vcombine.high %v1742_v50, %v1758_v39  ;;  %v1766_v60 = vcombine.low %v1742_v50, %v1758_v39  ;;  %v1782_v63 = vcombine.low %v1749_v61, %v1765_v56  ;;  %v1783_v2 = vcombine.high %v1749_v61, %v1765_v56 }
 0x3ae   : > { %v1028_v39 = vcombine.low %v6664_v58, %v6691_v36  ;;  %v1052_v50 = vrot.slane %v1044_v34, %v6674_v3 }
 0x3af   : > { %2010 = vxpose.xlu0.c.b16.start.end [1/1] (short) (narrow) %v6736_v9, 16  ;;  %v1781_v62 = vrot.slane %v1767_v55, %v6677_v10  ;;  %v1774_v0 = vrot.slane %v1766_v60, %v6677_v10  ;;  %v1790_v1 = vrot.slane %v1782_v63, %v6677_v10  ;;  %v1797_v6 = vrot.slane %v1783_v2, %v6677_v10 }
 0x3b0   : > { %v1043_v55 = vrot.slane %v1029_v38, %v6674_v3 }
 0x3b1   : > { %1834 = vxpose.xlu1.c.b16.start.end [1/1] (short) (narrow) %v1594_v12, 16  ;;  %v1798_v11 = vcombine.high %v1774_v0, %v6311_v23  ;;  %v804_v12 = vsub.s32 2, %v6647_v43  ;;  %v1800_v17 = vcombine.high %v1790_v1, %v6311_v23  ;;  %v1801_v19 = vcombine.high %v1797_v6, %v6311_v23 }
 0x3b3   : > { %2058 = vxpose.xlu0.c.b16.start.end [1/1] (short) (narrow) %v1706_v14, 16  ;;  %v1799_v14 = vcombine.high %v1781_v62, %v6311_v23  ;;  %v805_v15 = vrot.slane %v6651_v45, %v804_v12  ;;  %v1665_v45 = vcombine.high %v6736_v9, %v6311_v23 }
 0x3b5   : > { %1898 = vxpose.xlu1.c.b16.start.end [1/1] (short) (narrow) %v1595_v16, 16  ;;  %v1597_v16 = vcombine.high %v6731_v7, %v6311_v23  ;;  %v6779_v18 = vadd.f32 %v6657_v49, %v805_v15 }
 0x3b7   : > { %1850 = vxpose.xlu0.c.b16.start.end [1/1] (short) (narrow) %v1662_v26, 16 }
 0x3b9   : > { %1962 = vxpose.xlu1.c.b16.start.end [1/1] (short) (narrow) %v1596_v27, 16 }
 0x3bb   : > { %1914 = vxpose.xlu0.c.b16.start.end [1/1] (short) (narrow) %v1663_v31, 16 }
 0x3bd   : > { %2122 = vxpose.xlu1.c.b16.start.end [1/1] (short) (narrow) %v1713_v32, 16 }
 0x3bf   : > { %1978 = vxpose.xlu0.c.b16.start.end [1/1] (short) (narrow) %v1664_v35, 16  ;;  %v1045_v35 = vcombine.high %v6699_v47, %v6693_v37 }
 0x3c1   : > { %2186 = vxpose.xlu1.c.b16.start.end [1/1] (short) (narrow) %v1722_v40, 16  ;;  %v1059_v51 = vrot.slane %v1045_v35, %v6674_v3 }
 0x3c3   : > { %2090 = vxpose.xlu0.c.b16.start.end [1/1] (short) (narrow) %v1730_v54, 16  ;;  %v1036_v54 = vrot.slane %v1028_v39, %v6674_v3  ;;  %v1076_v37 = vcombine.low %v1043_v55, %v1059_v51  ;;  %v1077_v61 = vcombine.high %v1043_v55, %v1059_v51 }
 0x3c5   : > { %2250 = vxpose.xlu1.c.b16.start.end [1/1] (short) (narrow) %v1729_v59, 16  ;;  %v1060_v60 = vcombine.low %v1036_v54, %v1052_v50  ;;  %v1061_v47 = vcombine.high %v1036_v54, %v1052_v50  ;;  %v1084_v36 = vrot.slane %v1076_v37, %v6677_v10 }
 0x3c7   : > { %2138 = vxpose.xlu0.c.b16.start.end [1/1] (short) (narrow) %v1781_v62, 16  ;;  %v6831_v58 = vrot.slane %v1060_v60, %v6677_v10 }
 0x3c9   : > { %2074 = vxpose.xlu1.c.b16.start.end [1/1] (short) (narrow) %v1774_v0, 16  ;;  %v1075_v0 = vrot.slane %v1061_v47, %v6677_v10  ;;  %v5573_v34 = vpack.c.bf16 %v1084_v36, %v6831_v58 }
 0x3cb   : > { %2202 = vxpose.xlu0.c.b16.start.end [1/1] (short) (narrow) %v1790_v1, 16  ;;  %v1091_v1 = vrot.slane %v1077_v61, %v6677_v10 }
 0x3cd   : > { %2154 = vxpose.xlu1.c.b16.start.end [1/1] (short) (narrow) %v1731_v5, 16 }
 0x3cf   : > { %2266 = vxpose.xlu0.c.b16.start.end [1/1] (short) (narrow) %v1797_v6, 16  ;;  %v1092_v6 = vcombine.high %v6831_v58, %v6310_v4 }
 0x3d1   : > { %2218 = vxpose.xlu1.c.b16.start.end [1/1] (short) (narrow) %v1732_v8, 16  ;;  %v1094_v8 = vcombine.high %v1084_v36, %v6310_v4 }
 0x3d3   : > { %2106 = vxpose.xlu0.c.b16.start.end [1/1] (short) (narrow) %v1798_v11, 16  ;;  %v5575_v50 = vpack.c.bf16 %v1094_v8, %v1092_v6 }
 0x3d5   : > { %2282 = vxpose.xlu1.c.b16.start.end [1/1] (short) (narrow) %v1733_v13, 16  ;;  %v1308_v60 = vrot.slane %v5575_v50, %v6674_v3 }
 0x3d7   : > { %2170 = vxpose.xlu0.c.b16.start.end [1/1] (short) (narrow) %v1799_v14, 16 }
 0x3d9   : > { %2026 = vxpose.xlu1.c.b16.start.end [1/1] (short) (narrow) %v1597_v16, 16  ;;  %v1093_v16 = vcombine.high %v1075_v0, %v6310_v4 }
 0x3db   : > { %2234 = vxpose.xlu0.c.b16.start.end [1/1] (short) (narrow) %v1800_v17, 16  ;;  %v1095_v17 = vcombine.high %v1091_v1, %v6310_v4 }
 0x3dd   : > { %1191 = vrot.lane.b32.xlu1 %v6779_v18, %s6314_s20 }
 0x3df   : > { %2298 = vxpose.xlu0.c.b16.start.end [1/1] (short) (narrow) %v1801_v19, 16 }
 0x3e1   : > { %1197 = vrot.lane.b32.xlu1 %v6779_v18, %s6313_s0 }
 0x3e3   : > { %2042 = vxpose.xlu0.c.b16.start.end [1/1] (short) (narrow) %v1665_v45, 16 }
 0x3ec   : > { %1194 = vrot.lane.b32.xlu0 %v6779_v18, %s6315_s23 }
 0x403   : > { %v6790_v7 = vpop.trf.xlu1 }
 0x405   : > { %v6792_v49 = vpop.trf.xlu0 }
 0x407   : > { %v6794_v20 = vpop.trf.xlu1 }
 0x409   : > { %v6796_v21 = vpop.trf.xlu0 }
 0x40b   : > { %v6798_v22 = vpop.trf.xlu1 }
 0x40d   : > { %v6800_v24 = vpop.trf.xlu0 }
 0x40f   : > { %v6802_v25 = vpop.trf.xlu1 }
 0x410   : > { %v2330_v51 = vcombine.low %v6798_v22, %v6802_v25  ;;  %v2364_v22 = vcombine.low %v6792_v49, %v6796_v21 }
 0x411   : > { %v6804_v26 = vpop.trf.xlu0 }
 0x412   : > { %v2380_v54 = vcombine.low %v6800_v24, %v6804_v26  ;;  %v2371_v47 = vrot.slane %v2364_v22, %v6674_v3 }
 0x413   : > { %v6806_v9 = vpop.trf.xlu1 }
 0x414   : > { %v2387_v36 = vrot.slane %v2380_v54, %v6674_v3 }
 0x415   : > { %v2066_v27 = vpop.trf.xlu0 }
 0x417   : > { %v6808_v28 = vpop.trf.xlu1 }
 0x419   : > { %v6810_v53 = vpop.trf.xlu0 }
 0x41b   : > { %v6812_v52 = vpop.trf.xlu1 }
 0x41d   : > { %v6814_v29 = vpop.trf.xlu0 }
 0x41f   : > { %v2130_v57 = vpop.trf.xlu1 }
 0x420   : > { %v2414_v19 = vcombine.low %v2066_v27, %v2130_v57 }
 0x421   : > { %v6816_v41 = vpop.trf.xlu0 }
 0x422   : > { %v2421_v25 = vrot.slane %v2414_v19, %v6674_v3 }
 0x423   : > { %v2194_v30 = vpop.trf.xlu1 }
 0x425   : > { %v2098_v31 = vpop.trf.xlu0 }
 0x427   : > { %v2258_v48 = vpop.trf.xlu1 }
 0x428   : > { %v2430_v13 = vcombine.low %v2194_v30, %v2258_v48  ;;  %v2322_v30 = vcombine.low %v6806_v9, %v6808_v28 }
 0x429   : > { %v2146_v32 = vpop.trf.xlu0 }
 0x42a   : > { %v2437_v27 = vrot.slane %v2430_v13, %v6674_v3  ;;  %v2329_v55 = vrot.slane %v2322_v30, %v6674_v3 }
 0x42b   : > { %v2082_v33 = vpop.trf.xlu1 }
 0x42c   : > { %v2464_v35 = vcombine.low %v2082_v33, %v2146_v32  ;;  %v5576_v33 = vpack.c.bf16 %v1095_v17, %v1093_v16 }
 0x42d   : > { %v2210_v40 = vpop.trf.xlu0 }
 0x42e   : > { %v2471_v28 = vrot.slane %v2464_v35, %v6674_v3  ;;  %v1316_v58 = vrot.slane %v5576_v33, %v6674_v3 }
 0x42f   : > { %v2162_v42 = vpop.trf.xlu1 }
 0x430   : > { %v2422_v14 = vcombine.low %v2098_v31, %v2162_v42  ;;  %v2372_v31 = vcombine.low %v6810_v53, %v6814_v29  ;;  %v1317_v17 = vcombine.low %v1308_v60, %v1316_v58 }
 0x431   : > { %v2274_v56 = vpop.trf.xlu0 }
 0x432   : > { %v2429_v57 = vrot.slane %v2422_v14, %v6674_v3  ;;  %v2480_v48 = vcombine.low %v2210_v40, %v2274_v56  ;;  %v2337_v40 = vrot.slane %v2330_v51, %v6674_v3 }
 0x433   : > { %v2226_v59 = vpop.trf.xlu1 }
 0x434   : > { %v2487_v49 = vrot.slane %v2480_v48, %v6674_v3 }
 0x435   : > { %v2114_v62 = vpop.trf.xlu0 }
 0x437   : > { %v2290_v63 = vpop.trf.xlu1 }
 0x438   : > { %v2438_v5 = vcombine.low %v2226_v59, %v2290_v63  ;;  %v5574_v59 = vpack.c.bf16 %v1091_v1, %v1075_v0 }
 0x439   : > { %v2178_v2 = vpop.trf.xlu0 }
 0x43a   : > { %v2472_v15 = vcombine.low %v2114_v62, %v2178_v2  ;;  %v2445_v39 = vrot.slane %v2438_v5, %v6674_v3  ;;  %v1291_v13 = vrot.slane %v5574_v59, %v6674_v3 }
 0x43b   : > { %v2034_v11 = vpop.trf.xlu1 }
 0x43c   : > { %v2338_v38 = vcombine.low %v6812_v52, %v2034_v11  ;;  %v2479_v32 = vrot.slane %v2472_v15, %v6674_v3  ;;  %v2314_v52 = vcombine.low %v6790_v7, %v6794_v20  ;;  %v2454_v53 = vcombine.low %v2437_v27, %v2445_v39 }
 0x43d   : > { %v2242_v45 = vpop.trf.xlu0  ;;  %v2379_v7 = vrot.slane %v2372_v31, %v6674_v3  ;;  %v2446_v20 = vcombine.low %v2421_v25, %v2429_v57  ;;  %v1283_v11 = vrot.slane %v5573_v34, %v6674_v3  ;;  %v1324_v34 = vrot.slane %v1317_v17, %v6677_v10 }
 0x43e   : > { %v2345_v29 = vrot.slane %v2338_v38, %v6674_v3  ;;  %v2496_v21 = vcombine.low %v2471_v28, %v2479_v32  ;;  %v2321_v37 = vrot.slane %v2314_v52, %v6674_v3  ;;  %v2461_v24 = vrot.slane %v2454_v53, %v6677_v10 }
 0x43f   : > { %v2396_v5 = vcombine.low %v2371_v47, %v2379_v7  ;;  %v2453_v0 = vrot.slane %v2446_v20, %v6677_v10  ;;  %v1292_v38 = vcombine.low %v1283_v11, %v1291_v13  ;;  %v1330_v25 = vshrl.u32 %v1324_v34, 16 }
 0x440   : > { %v2354_v26 = vcombine.low %v2337_v40, %v2345_v29  ;;  %v2346_v2 = vcombine.low %v2321_v37, %v2329_v55  ;;  %v2503_v1 = vrot.slane %v2496_v21, %v6677_v10  ;;  %v1325_v60 = vcombine.high %v1324_v34, %v6311_v23 }
 0x441   : > { %v2306_v9 = vpop.trf.xlu0  ;;  %v2462_v14 = vcombine.low %v2453_v0, %v2461_v24  ;;  %v1299_v27 = vrot.slane %v1292_v38, %v6677_v10  ;;  %v2463_v29 = vcombine.high %v2453_v0, %v2461_v24 }
 0x442   : > { %v2488_v42 = vcombine.low %v2242_v45, %v2306_v9  ;;  %v2353_v19 = vrot.slane %v2346_v2, %v6677_v10  ;;  %v2403_v45 = vrot.slane %v2396_v5, %v6677_v10 }
 0x443   : > { %v2534_v57 = vshrl.u32 %v2462_v14, 16  ;;  %v1328_v48 = vpack.i.b16 %v1324_v34, %v1299_v27  ;;  %v1329_v53 = vshrl.u32 %v1299_v27, 16 }
 0x444   : > { %v2495_v56 = vrot.slane %v2488_v42, %v6674_v3 }
 0x445   : > { %v2050_v61 = vpop.trf.xlu0  ;;  %v1331_v40 = vpack.i.b16 %v1330_v25, %v1329_v53 }
 0x446   : > { %v2504_v62 = vcombine.low %v2487_v49, %v2495_v56  ;;  %v2388_v63 = vcombine.low %v6816_v41, %v2050_v61  ;;  %v2361_v41 = vrot.slane %v2354_v26, %v6677_v10 }
 0x448   : > { %v2511_v6 = vrot.slane %v2504_v62, %v6677_v10  ;;  %v2395_v8 = vrot.slane %v2388_v63, %v6674_v3  ;;  %v2362_v50 = vcombine.low %v2353_v19, %v2361_v41  ;;  %v2363_v20 = vcombine.high %v2353_v19, %v2361_v41 }
 0x449   : > { %v1300_v62 = vcombine.high %v1299_v27, %v6311_v23  ;;  %v2542_v63 = vshrl.u32 %v2463_v29, 16  ;;  %v1336_v41 = vshrl.u32 %v1325_v60, 16 }
 0x44a   : > { %v2512_v15 = vcombine.low %v2503_v1, %v2511_v6  ;;  %v2404_v16 = vcombine.low %v2387_v36, %v2395_v8  ;;  %v2518_v22 = vshrl.u32 %v2362_v50, 16  ;;  %v2513_v9 = vcombine.high %v2503_v1, %v2511_v6 }
 0x44b   : > { %v1334_v2 = vpack.i.b16 %v1325_v60, %v1300_v62  ;;  %v2526_v11 = vshrl.u32 %v2363_v20, 16  ;;  %v1335_v19 = vshrl.u32 %v1300_v62, 16 }
 0x44c   : > { %v2411_v35 = vrot.slane %v2404_v16, %v6677_v10  ;;  %v2532_v39 = vpack.i.b16 %v2512_v15, %v2462_v14  ;;  %v2535_v31 = vshrl.u32 %v2512_v15, 16  ;;  %v2540_v55 = vpack.i.b16 %v2513_v9, %v2463_v29 }
 0x44d   : > { %v2543_v47 = vshrl.u32 %v2513_v9, 16 }
 0x44e   : > { %v2412_v51 = vcombine.low %v2403_v45, %v2411_v35  ;;  %5780 = vmatpush3.bf16.msra.mxu1 %v2532_v39  ;;  %v2536_v33 = vpack.i.b16 %v2535_v31, %v2534_v57  ;;  %v2413_v54 = vcombine.high %v2403_v45, %v2411_v35  ;;  %v1337_v39 = vpack.i.b16 %v1336_v41, %v1335_v19 }
 0x44f   : > { %5781 = vmatprep.subr.bf16.mxu1 %v6310_v4  ;;  %v1192_v32 = vpop.permute.xlu1 %1191  ;;  %v2544_v5 = vpack.i.b16 %v2543_v47, %v2542_v63 }
 0x450   : > { %v2516_v30 = vpack.i.b16 %v2412_v51, %v2362_v50  ;;  %v2519_v52 = vshrl.u32 %v2412_v51, 16  ;;  %v2524_v37 = vpack.i.b16 %v2413_v54, %v2363_v20  ;;  %v2527_v0 = vshrl.u32 %v2413_v54, 16 }
 0x452   : > { %5782 = vmatpush3.bf16.msra.mxu1 %v2516_v30  ;;  %v2520_v28 = vpack.i.b16 %v2519_v52, %v2518_v22  ;;  %v2528_v15 = vpack.i.b16 %v2527_v0, %v2526_v11 }
 0x453   : > { %5787 = vmatprep.subr.bf16.mxu1 %v6310_v4  ;;  %v1198_v42 = vpop.permute.xlu1 %1197 }
 0x454   : > { %v1216_v7 = vcombine.low %v1192_v32, %v1198_v42  ;;  %v1217_v21 = vcombine.high %v1192_v32, %v1198_v42 }
 0x455   : > { %5784 = vmatmul.mubr.msk.bf16.vlgmr.msra.gmra.mxu1 %vm2546_vm1, %v1328_v48 }
 0x456   : > { %5788 = vmatpush3.bf16.msra.mxu1 %v2536_v33  ;;  %5791 = vmatprep.mubr.msk.bf16.mxu1 %vm6312_vm0, %v6310_v4  ;;  %v1224_v61 = vrot.slane %v1216_v7, %v6674_v3  ;;  %v1231_v58 = vrot.slane %v1217_v21, %v6674_v3 }
 0x457   : > { %5789 = vmatprep.subr.bf16.mxu1 %v6310_v4 }
 0x45a   : > { %5790 = vmatpush3.bf16.msra.mxu1 %v2520_v28 }
 0x45b   : > { %5795 = vmatprep.subr.bf16.mxu1 %v6310_v4 }
 0x45d   : > { %5792 = vmatmul.mubr.msk.bf16.vlgmr.msra.gmra.mxu1 %vm2546_vm1, %v1331_v40 }
 0x45e   : > { %5796 = vmatpush3.bf16.msra.mxu1 %v2540_v55  ;;  %v1195_v49 = vpop.permute.xlu0 %1194  ;;  %5799 = vmatprep.mubr.msk.bf16.mxu1 %vm6312_vm0, %v6310_v4 }
 0x45f   : > { %v1200_v56 = vcombine.low %v6779_v18, %v1195_v49  ;;  %v1201_v59 = vcombine.high %v6779_v18, %v1195_v49  ;;  %5797 = vmatprep.subr.bf16.mxu1 %v6310_v4 }
 0x461   : > { %v1208_v24 = vrot.slane %v1200_v56, %v6674_v3  ;;  %v1215_v26 = vrot.slane %v1201_v59, %v6674_v3 }
 0x462   : > { %5798 = vmatpush3.bf16.msra.mxu1 %v2524_v37 }
 0x463   : > { %v1232_v36 = vcombine.low %v1208_v24, %v1224_v61  ;;  %v1233_v18 = vcombine.high %v1208_v24, %v1224_v61  ;;  %5803 = vmatprep.subr.bf16.mxu1 %v6310_v4  ;;  %v1248_v1 = vcombine.low %v1215_v26, %v1231_v58  ;;  %v1249_v35 = vcombine.high %v1215_v26, %v1231_v58 }
 0x465   : > { %5800 = vmatmul.mubr.msk.bf16.vlgmr.msra.gmra.mxu1 %vm2546_vm1, %v1334_v2  ;;  %v1240_v6 = vrot.slane %v1232_v36, %v6677_v10  ;;  %v1247_v8 = vrot.slane %v1233_v18, %v6677_v10  ;;  %v1256_v45 = vrot.slane %v1248_v1, %v6677_v10  ;;  %v1263_v34 = vrot.slane %v1249_v35, %v6677_v10 }
 0x466   : > { %5804 = vmatpush3.bf16.msra.mxu1 %v2544_v5  ;;  %5807 = vmatprep.mubr.msk.bf16.mxu1 %vm6312_vm0, %v6310_v4 }
 0x467   : > { %5805 = vmatprep.subr.bf16.mxu1 %v6310_v4  ;;  %v1268_v13 = vpack.c.bf16 %v1240_v6, %v1240_v6  ;;  %v1264_v14 = vcombine.high %v1240_v6, %v6310_v4  ;;  %v1265_v16 = vcombine.high %v1247_v8, %v6310_v4  ;;  %v1266_v50 = vcombine.high %v1256_v45, %v6310_v4 }
 0x468   : > { %v1270_v51 = vpack.c.bf16 %v1247_v8, %v1247_v8  ;;  %v1267_v31 = vcombine.high %v1263_v34, %v6310_v4  ;;  %v1272_v27 = vpack.c.bf16 %v1256_v45, %v1256_v45  ;;  %v1274_v48 = vpack.c.bf16 %v1263_v34, %v1263_v34 }
 0x469   : > { %2768 = vxpose.xlu1.c.b16.start.end [1/1] (short) (narrow) %v1268_v13, 32  ;;  %v1269_v17 = vpack.c.bf16 %v1264_v14, %v1264_v14  ;;  %v1271_v38 = vpack.c.bf16 %v1265_v16, %v1265_v16  ;;  %v1273_v30 = vpack.c.bf16 %v1266_v50, %v1266_v50 }
 0x46a   : > { %5806 = vmatpush3.bf16.msra.mxu1 %v2528_v15  ;;  %v1275_v57 = vpack.c.bf16 %v1267_v31, %v1267_v31 }
 0x46b   : > { %2784 = vxpose.xlu0.c.b16.start.end [1/1] (short) (narrow) %v1269_v17, 32 }
 0x46d   : > { %5808 = vmatmul.mubr.msk.bf16.vlgmr.msra.gmra.mxu1 %vm2546_vm1, %v1337_v39 }
 0x46e   : > { %2816 = vxpose.xlu1.c.b16.start.end [1/1] (short) (narrow) %v1271_v38, 32 }
 0x470   : > { %2800 = vxpose.xlu0.c.b16.start.end [1/1] (short) (narrow) %v1270_v51, 32 }
 0x473   : > { %2848 = vxpose.xlu1.c.b16.start.end [1/1] (short) (narrow) %v1273_v30, 32 }
 0x475   : > { %2832 = vxpose.xlu0.c.b16.start.end [1/1] (short) (narrow) %v1272_v27, 32 }
 0x478   : > { %2880 = vxpose.xlu1.c.b16.start.end [1/1] (short) (narrow) %v1275_v57, 32 }
 0x47a   : > { %2864 = vxpose.xlu0.c.b16.start.end [1/1] (short) (narrow) %v1274_v48, 32 }
 0x4cb   : > { %v2776_v32 = vpop.trf.xlu1 }
 0x4cc   : > { %v2900_v63 = vshrl.u32 %v2776_v32, 16 }
 0x4cd   : > { %v2792_v33 = vpop.trf.xlu0 }
 0x4ce   : > { %v6929_v58 = vpack.i.b16 %v2792_v33, %v2776_v32  ;;  %v2901_v36 = vshrl.u32 %v2792_v33, 16 }
 0x4cf   : > { %v2777_v52 = vpop.trf.xlu1 }
 0x4d0   : > { %v2932_v22 = vshrl.u32 %v2777_v52, 16  ;;  %v6941_v19 = vpack.i.b16 %v2901_v36, %v2900_v63 }
 0x4d1   : > { %v2793_v25 = vpop.trf.xlu0 }
 0x4d2   : > { %v6919_v9 = vpack.i.b16 %v2793_v25, %v2777_v52  ;;  %v2933_v28 = vshrl.u32 %v2793_v25, 16 }
 0x4d3   : > { %v2824_v53 = vpop.trf.xlu1 }
 0x4d4   : > { %v6921_v29 = vpack.i.b16 %v2933_v28, %v2932_v22  ;;  %v2909_v2 = vshrl.u32 %v2824_v53, 16 }
 0x4d5   : > { %v2808_v42 = vpop.trf.xlu0 }
 0x4d6   : > { %v2906_v6 = vpack.i.b16 %v2824_v53, %v2808_v42  ;;  %v2908_v8 = vshrl.u32 %v2808_v42, 16 }
 0x4d7   : > { %v2825_v40 = vpop.trf.xlu1 }
 0x4d8   : > { %v2941_v54 = vshrl.u32 %v2825_v40, 16  ;;  %v2910_v38 = vpack.i.b16 %v2909_v2, %v2908_v8 }
 0x4d9   : > { %v2809_v55 = vpop.trf.xlu0 }
 0x4da   : > { %v6923_v7 = vpack.i.b16 %v2825_v40, %v2809_v55  ;;  %v2940_v20 = vshrl.u32 %v2809_v55, 16 }
 0x4db   : > { %v2856_v49 = vpop.trf.xlu1 }
 0x4dc   : > { %v2942_v21 = vpack.i.b16 %v2941_v54, %v2940_v20  ;;  %v2917_v37 = vshrl.u32 %v2856_v49, 16 }
 0x4dd   : > { %v2840_v56 = vpop.trf.xlu0 }
 0x4de   : > { %v2916_v47 = vshrl.u32 %v2840_v56, 16  ;;  %v6925_v24 = vpack.i.b16 %v2856_v49, %v2840_v56 }
 0x4df   : > { %v2857_v59 = vpop.trf.xlu1 }
 0x4e0   : > { %v2949_v60 = vshrl.u32 %v2857_v59, 16  ;;  %v6935_v11 = vpack.i.b16 %v2917_v37, %v2916_v47  ;;  %v2960_v41 = vcombine.low %v6929_v58, %v6925_v24 }
 0x4e1   : > { %v2841_v61 = vpop.trf.xlu0 }
 0x4e2   : > { %v6927_v26 = vpack.i.b16 %v2857_v59, %v2841_v61  ;;  %v2948_v62 = vshrl.u32 %v2841_v61, 16  ;;  %v3028_v50 = vcombine.low %v6941_v19, %v6935_v11  ;;  %v2968_v57 = vrot.slane %v2960_v41, %v6674_v3 }
 0x4e3   : > { %v2888_v18 = vpop.trf.xlu1 }
 0x4e4   : > { %v2950_v5 = vpack.i.b16 %v2949_v60, %v2948_v62  ;;  %v3096_v0 = vcombine.low %v6919_v9, %v6927_v26  ;;  %v3097_v1 = vcombine.high %v6919_v9, %v6927_v26  ;;  %v2925_v13 = vshrl.u32 %v2888_v18, 16 }
 0x4e5   : > { %v2872_v14 = vpop.trf.xlu0  ;;  %v3036_v9 = vrot.slane %v3028_v50, %v6674_v3  ;;  %v2961_v62 = vcombine.high %v6929_v58, %v6925_v24  ;;  %v3029_v58 = vcombine.high %v6941_v19, %v6935_v11 }
 0x4e6   : > { %v3164_v15 = vcombine.low %v6921_v29, %v2950_v5  ;;  %v3165_v16 = vcombine.high %v6921_v29, %v2950_v5  ;;  %v2922_v17 = vpack.i.b16 %v2888_v18, %v2872_v14  ;;  %v2924_v45 = vshrl.u32 %v2872_v14, 16 }
 0x4e7   : > { %v2889_v35 = vpop.trf.xlu1  ;;  %v6988_v8 = vrot.slane %v3097_v1, %v6674_v3  ;;  %v3043_v19 = vrot.slane %v3029_v58, %v6674_v3 }
 0x4e8   : > { %v2976_v39 = vcombine.low %v2906_v6, %v2922_v17  ;;  %v2926_v51 = vpack.i.b16 %v2925_v13, %v2924_v45  ;;  %v2957_v34 = vshrl.u32 %v2889_v35, 16  ;;  %v6956_v55 = vrot.slane %v3164_v15, %v6674_v3 }
 0x4e9   : > { %v2873_v30 = vpop.trf.xlu0  ;;  %v2977_v56 = vcombine.high %v2906_v6, %v2922_v17  ;;  %v6972_v47 = vrot.slane %v3165_v16, %v6674_v3  ;;  %v2975_v13 = vrot.slane %v2961_v62, %v6674_v3 }
 0x4ea   : > { %v2954_v31 = vpack.i.b16 %v2889_v35, %v2873_v30  ;;  %v2956_v27 = vshrl.u32 %v2873_v30, 16  ;;  %v2984_v48 = vrot.slane %v2976_v39, %v6674_v3  ;;  %v3044_v32 = vcombine.low %v2910_v38, %v2926_v51 }
 0x4eb   : > { %v3045_v63 = vcombine.high %v2910_v38, %v2926_v51  ;;  %v2991_v6 = vrot.slane %v2977_v56, %v6674_v3 }
 0x4ec   : > { %v2958_v33 = vpack.i.b16 %v2957_v34, %v2956_v27  ;;  %v3112_v52 = vcombine.low %v6923_v7, %v2954_v31  ;;  %v3113_v22 = vcombine.high %v6923_v7, %v2954_v31  ;;  %v2992_v25 = vcombine.low %v2968_v57, %v2984_v48 }
 0x4ed   : > { %v3052_v28 = vrot.slane %v3044_v32, %v6674_v3  ;;  %v6962_v7 = vrot.slane %v3096_v0, %v6674_v3  ;;  %v2993_v60 = vcombine.high %v2968_v57, %v2984_v48  ;;  %v3059_v16 = vrot.slane %v3045_v63, %v6674_v3 }
 0x4ee   : > { %v3180_v53 = vcombine.low %v2942_v21, %v2958_v33  ;;  %v3181_v29 = vcombine.high %v2942_v21, %v2958_v33  ;;  %v3000_v42 = vrot.slane %v2992_v25, %v6677_v10  ;;  %v6953_v40 = vrot.slane %v3112_v52, %v6674_v3 }
 0x4ef   : > { %v3060_v54 = vcombine.low %v3036_v9, %v3052_v28  ;;  %v3061_v18 = vcombine.high %v3036_v9, %v3052_v28  ;;  %v3007_v0 = vrot.slane %v2993_v60, %v6677_v10  ;;  %v6991_v24 = vrot.slane %v3113_v22, %v6674_v3 }
 0x4f0   : > { %v6959_v20 = vrot.slane %v3180_v53, %v6674_v3  ;;  %3232 = vxpose.xlu0.c.b16.start.end [1/1] (short) (narrow) %v3000_v42, 16  ;;  %v6965_v49 = vrot.slane %v3181_v29, %v6674_v3  ;;  %v3024_v59 = vcombine.high %v3000_v42, %v6311_v23  ;;  %v3128_v61 = vcombine.low %v6962_v7, %v6953_v40 }
 0x4f1   : > { %v3068_v21 = vrot.slane %v3060_v54, %v6677_v10  ;;  %v3129_v2 = vcombine.high %v6962_v7, %v6953_v40  ;;  %v3144_v14 = vcombine.low %v6988_v8, %v6991_v24  ;;  %v3145_v1 = vcombine.high %v6988_v8, %v6991_v24 }
 0x4f2   : > { %v3196_v37 = vcombine.low %v6956_v55, %v6959_v20  ;;  %v3197_v26 = vcombine.high %v6956_v55, %v6959_v20  ;;  %v3212_v5 = vcombine.low %v6972_v47, %v6965_v49  ;;  %v3213_v41 = vcombine.high %v6972_v47, %v6965_v49 }
 0x4f3   : > { %3248 = vxpose.xlu1.c.b16.start.end [1/1] (short) (narrow) %v3068_v21, 16  ;;  %v3092_v36 = vcombine.high %v3068_v21, %v6311_v23  ;;  %v3075_v15 = vrot.slane %v3061_v18, %v6677_v10  ;;  %v3025_v17 = vcombine.high %v3007_v0, %v6311_v23  ;;  %v3008_v11 = vcombine.low %v2975_v13, %v2991_v6 }
 0x4f4   : > { %3264 = vxpose.xlu0.c.b16.start.end [1/1] (short) (narrow) %v3024_v59, 16  ;;  %v3076_v35 = vcombine.low %v3043_v19, %v3059_v16  ;;  %v3009_v51 = vcombine.high %v2975_v13, %v2991_v6  ;;  %v3077_v30 = vcombine.high %v3043_v19, %v3059_v16  ;;  %v3204_v18 = vrot.slane %v3196_v37, %v6677_v10 }
 0x4f5   : > { %v3093_v45 = vcombine.high %v3075_v15, %v6311_v23  ;;  %v3016_v39 = vrot.slane %v3008_v11, %v6677_v10  ;;  %v3152_v55 = vrot.slane %v3144_v14, %v6677_v10  ;;  %v3227_v7 = vrot.slane %v3213_v41, %v6677_v10 }
 0x4f6   : > { %v3084_v38 = vrot.slane %v3076_v35, %v6677_v10  ;;  %v3023_v31 = vrot.slane %v3009_v51, %v6677_v10  ;;  %v3091_v27 = vrot.slane %v3077_v30, %v6677_v10 }
 0x4f7   : > { %3280 = vxpose.xlu1.c.b16.start.end [1/1] (short) (narrow) %v3092_v36, 16  ;;  %v3026_v50 = vcombine.high %v3016_v39, %v6311_v23  ;;  %v3162_v20 = vcombine.high %v3152_v55, %v6311_v23 }
 0x4f8   : > { %3296 = vxpose.xlu0.c.b16.start.end [1/1] (short) (narrow) %v3007_v0, 16  ;;  %v3094_v34 = vcombine.high %v3084_v38, %v6311_v23  ;;  %v3027_v57 = vcombine.high %v3023_v31, %v6311_v23  ;;  %v3095_v48 = vcombine.high %v3091_v27, %v6311_v23  ;;  %v3136_v0 = vrot.slane %v3128_v61, %v6677_v10 }
 0x4fb   : > { %3312 = vxpose.xlu1.c.b16.start.end [1/1] (short) (narrow) %v3075_v15, 16 }
 0x4fc   : > { %3328 = vxpose.xlu0.c.b16.start.end [1/1] (short) (narrow) %v3025_v17, 16 }
 0x4ff   : > { %3344 = vxpose.xlu1.c.b16.start.end [1/1] (short) (narrow) %v3093_v45, 16 }
 0x500   : > { %3360 = vxpose.xlu0.c.b16.start.end [1/1] (short) (narrow) %v3016_v39, 16 }
 0x503   : > { %3376 = vxpose.xlu1.c.b16.start.end [1/1] (short) (narrow) %v3084_v38, 16 }
 0x504   : > { %3392 = vxpose.xlu0.c.b16.start.end [1/1] (short) (narrow) %v3026_v50, 16 }
 0x507   : > { %3408 = vxpose.xlu1.c.b16.start.end [1/1] (short) (narrow) %v3094_v34, 16 }
 0x508   : > { %3424 = vxpose.xlu0.c.b16.start.end [1/1] (short) (narrow) %v3023_v31, 16 }
 0x50b   : > { %3440 = vxpose.xlu1.c.b16.start.end [1/1] (short) (narrow) %v3091_v27, 16 }
 0x50c   : > { %3456 = vxpose.xlu0.c.b16.start.end [1/1] (short) (narrow) %v3027_v57, 16 }
 0x50f   : > { %3472 = vxpose.xlu1.c.b16.start.end [1/1] (short) (narrow) %v3095_v48, 16 }
 0x515   : > { %v7015_v32 = vpop.f32.mrf.mxu1 }
 0x516   : > { %v2720_v25 = vsel %vm2719_vm2, %v7015_v32, -inf }
 0x517   : > { %v5785_v33 = vpop.f32.mrf.mxu1 }
 0x519   : > { %v2587_v52 = vpop.f32.mrf.mxu1 }
 0x51b   : > { %v5786_v22 = vpop.f32.mrf.mxu1 }
 0x51c   : > { %2721 = vmax.xlane.f32.xlu1 %v2720_v25 }
 0x51d   : > { %v7019_v9 = vpop.f32.mrf.mxu1 }
 0x51e   : > { %v2723_v28 = vsel %vm2719_vm2, %v7019_v9, -inf }
 0x51f   : > { %v5793_v53 = vpop.f32.mrf.mxu1  ;;  %2724 = vmax.xlane.f32.xlu0 %v2723_v28 }
 0x521   : > { %v2630_v29 = vpop.f32.mrf.mxu1 }
 0x523   : > { %v5794_v42 = vpop.f32.mrf.mxu1 }
 0x525   : > { %v7023_v54 = vpop.f32.mrf.mxu1 }
 0x526   : > { %v2726_v58 = vsel %vm2719_vm2, %v7023_v54, -inf }
 0x527   : > { %v5801_v21 = vpop.f32.mrf.mxu1 }
 0x529   : > { %v2673_v56 = vpop.f32.mrf.mxu1 }
 0x52b   : > { %v5802_v59 = vpop.f32.mrf.mxu1 }
 0x52d   : > { %v7025_v60 = vpop.f32.mrf.mxu1 }
 0x52e   : > { %v2729_v16 = vsel %vm2719_vm2, %v7025_v60, -inf }
 0x52f   : > { %v5809_v62 = vpop.f32.mrf.mxu1 }
 0x531   : > { %v2716_v63 = vpop.f32.mrf.mxu1 }
 0x533   : > { %v5810_v36 = vpop.f32.mrf.mxu1 }
 0x549   : > { %3504 = vxpose.xlu1.c.b16.start.end [1/1] (short) (narrow) %v3204_v18, 16 }
 0x54c   : > { %3488 = vxpose.xlu0.c.b16.start.end [1/1] (short) (narrow) %v3136_v0, 16 }
 0x552   : > { %v3240_v6 = vpop.trf.xlu0 }
 0x555   : > { %v3256_v13 = vpop.trf.xlu1 }
 0x556   : > { %2727 = vmax.xlane.f32.xlu1 %v2726_v58  ;;  %v3272_v15 = vpop.trf.xlu0 }
 0x559   : > { %2730 = vmax.xlane.f32.xlu0 %v2729_v16  ;;  %v3288_v17 = vpop.trf.xlu1 }
 0x55a   : > { %v3304_v37 = vpop.trf.xlu0 }
 0x55b   : > { %v3744_v38 = vcombine.low %v3240_v6, %v3304_v37 }
 0x55d   : > { %v3320_v11 = vpop.trf.xlu1  ;;  %v3751_v27 = vrot.slane %v3744_v38, %v6674_v3 }
 0x55e   : > { %v3336_v19 = vpop.trf.xlu0  ;;  %v3794_v34 = vcombine.low %v3256_v13, %v3320_v11 }
 0x55f   : > { %v3752_v50 = vcombine.low %v3272_v15, %v3336_v19 }
 0x560   : > { %v3801_v52 = vrot.slane %v3794_v34, %v6674_v3 }
 0x561   : > { %v3352_v45 = vpop.trf.xlu1  ;;  %v3759_v57 = vrot.slane %v3752_v50, %v6674_v3 }
 0x562   : > { %v3368_v35 = vpop.trf.xlu0  ;;  %v3802_v30 = vcombine.low %v3288_v17, %v3352_v45 }
 0x563   : > { %v3776_v53 = vcombine.low %v3751_v27, %v3759_v57  ;;  %v3160_v27 = vcombine.high %v3136_v0, %v6311_v23  ;;  %v3211_v57 = vrot.slane %v3197_v26, %v6677_v10  ;;  %v3220_v0 = vrot.slane %v3212_v5, %v6677_v10 }
 0x564   : > { %v3809_v22 = vrot.slane %v3802_v30, %v6674_v3  ;;  %v3159_v26 = vrot.slane %v3145_v1, %v6677_v10 }
 0x565   : > { %v3384_v39 = vpop.trf.xlu1  ;;  %v3783_v36 = vrot.slane %v3776_v53, %v6677_v10  ;;  %v3230_v40 = vcombine.high %v3220_v0, %v6311_v23 }
 0x566   : > { %v3400_v61 = vpop.trf.xlu0  ;;  %v3826_v59 = vcombine.low %v3801_v52, %v3809_v22 }
 0x568   : > { %v3833_v15 = vrot.slane %v3826_v59, %v6677_v10 }
 0x569   : > { %v3416_v51 = vpop.trf.xlu1 }
 0x56a   : > { %v3432_v31 = vpop.trf.xlu0 }
 0x56b   : > { %v3760_v48 = vcombine.low %v3368_v35, %v3432_v31  ;;  %v3228_v31 = vcombine.high %v3204_v18, %v6311_v23 }
 0x56d   : > { %v3448_v33 = vpop.trf.xlu1  ;;  %v3767_v29 = vrot.slane %v3760_v48, %v6674_v3  ;;  %v3143_v48 = vrot.slane %v3129_v2, %v6677_v10 }
 0x56e   : > { %v3810_v25 = vcombine.low %v3384_v39, %v3448_v33  ;;  %v3464_v28 = vpop.trf.xlu0  ;;  %v3229_v33 = vcombine.high %v3211_v57, %v6311_v23 }
 0x56f   : > { %v3768_v42 = vcombine.low %v3400_v61, %v3464_v28  ;;  %v3161_v18 = vcombine.high %v3143_v48, %v6311_v23 }
 0x570   : > { %v3817_v62 = vrot.slane %v3810_v25, %v6674_v3 }
 0x571   : > { %v3480_v21 = vpop.trf.xlu1  ;;  %v3775_v56 = vrot.slane %v3768_v42, %v6674_v3 }
 0x572   : > { %v3818_v63 = vcombine.low %v3416_v51, %v3480_v21 }
 0x573   : > { %v3784_v6 = vcombine.low %v3767_v29, %v3775_v56 }
 0x574   : > { %v3825_v58 = vrot.slane %v3818_v63, %v6674_v3 }
 0x575   : > { %v3791_v13 = vrot.slane %v3784_v6, %v6677_v10 }
 0x576   : > { %v3834_v16 = vcombine.low %v3817_v62, %v3825_v58 }
 0x577   : > { %v3792_v17 = vcombine.low %v3783_v36, %v3791_v13  ;;  %v7050_v37 = vcombine.high %v3783_v36, %v3791_v13 }
 0x578   : > { %v3841_v11 = vrot.slane %v3834_v16, %v6677_v10 }
 0x579   : > { %v3947_v35 = vshrl.u32 %v3792_v17, 16  ;;  %v3953_v39 = vshrl.u32 %v7050_v37, 16 }
 0x57a   : > { %v3842_v19 = vcombine.low %v3833_v15, %v3841_v11  ;;  %v7053_v45 = vcombine.high %v3833_v15, %v3841_v11 }
 0x57c   : > { %v3946_v61 = vpack.i.b16 %v3842_v19, %v3792_v17  ;;  %v3948_v38 = vshrl.u32 %v3842_v19, 16  ;;  %v3952_v50 = vpack.i.b16 %v7053_v45, %v7050_v37  ;;  %v3954_v51 = vshrl.u32 %v7053_v45, 16 }
 0x57e   : > { %5813 = vmatprep.mubr.msk.bf16.mxu0 %vm2719_vm2, %v3946_v61  ;;  %v3949_v34 = vpack.i.b16 %v3948_v38, %v3947_v35  ;;  %v7060_v30 = vpack.i.b16 %v3954_v51, %v3953_v39  ;;  %v3163_v51 = vcombine.high %v3159_v26, %v6311_v23 }
 0x580   : > { %5819 = vmatprep.mubr.msk.bf16.mxu1 %vm2719_vm2, %v3949_v34  ;;  %v3231_v34 = vcombine.high %v3227_v7, %v6311_v23 }
 0x583   : > { %3536 = vxpose.xlu1.c.b16.start.end [1/1] (short) (narrow) %v3228_v31, 16 }
 0x586   : > { %3520 = vxpose.xlu0.c.b16.start.end [1/1] (short) (narrow) %v3160_v27, 16 }
 0x587   : > { %3568 = vxpose.xlu1.c.b16.start.end [1/1] (short) (narrow) %v3211_v57, 16 }
 0x58a   : > { %3552 = vxpose.xlu0.c.b16.start.end [1/1] (short) (narrow) %v3143_v48, 16 }
 0x58b   : > { %3600 = vxpose.xlu1.c.b16.start.end [1/1] (short) (narrow) %v3229_v33, 16 }
 0x58e   : > { %3584 = vxpose.xlu0.c.b16.start.end [1/1] (short) (narrow) %v3161_v18, 16 }
 0x58f   : > { %3632 = vxpose.xlu1.c.b16.start.end [1/1] (short) (narrow) %v3220_v0, 16 }
 0x592   : > { %3616 = vxpose.xlu0.c.b16.start.end [1/1] (short) (narrow) %v3152_v55, 16 }
 0x593   : > { %3664 = vxpose.xlu1.c.b16.start.end [1/1] (short) (narrow) %v3230_v40, 16 }
 0x596   : > { %3648 = vxpose.xlu0.c.b16.start.end [1/1] (short) (narrow) %v3162_v20, 16 }
 0x597   : > { %3696 = vxpose.xlu1.c.b16.start.end [1/1] (short) (narrow) %v3227_v7, 16 }
 0x59a   : > { %3680 = vxpose.xlu0.c.b16.start.end [1/1] (short) (narrow) %v3159_v26, 16 }
 0x5a5   : > { %v2722_v2 = vpop.xlane.xlu1 %2721 }
 0x5a6   : > { %v2732_v5 = vsub.f32 %v7015_v32, %v2722_v2 }
 0x5a8   : > { %v2736_v14 = vmul.f32 1.442695, %v2732_v5  ;;  %v2725_v52 = vpop.xlane.xlu0 %2724 }
 0x5a9   : > { %v2733_v22 = vsub.f32 %v7019_v9, %v2725_v52 }
 0x5aa   : > { %6085 = vpow2.f32 %v2736_v14 }
 0x5ab   : > { %v2738_v25 = vmul.f32 1.442695, %v2733_v22  ;;  %v3512_v8 = vpop.trf.xlu1 }
 0x5ad   : > { %6087 = vpow2.f32 %v2738_v25 }
 0x5ae   : > { %v3496_v24 = vpop.trf.xlu0 }
 0x5b7   : > { %v6086_v49 = vpop.eup %6085 }
 0x5b8   : > { %v2744_v47 = vsel %vm2719_vm2, %v6086_v49, 0.0 }
 0x5b9   : > { %2745 = vadd.xlane.f32.xlu0 %v2744_v47 }
 0x5ba   : > { %v6088_v41 = vpop.eup %6087 }
 0x5bb   : > { %v2747_v28 = vsel %vm2719_vm2, %v6088_v41, 0.0 }
 0x5bc   : > { %2748 = vadd.xlane.f32.xlu1 %v2747_v28 }
 0x5df   : > { %v2728_v1 = vpop.xlane.xlu1 %2727 }
 0x5e0   : > { %v2734_v32 = vsub.f32 %v7023_v54, %v2728_v1 }
 0x5e2   : > { %v2740_v53 = vmul.f32 1.442695, %v2734_v32  ;;  %v2731_v29 = vpop.xlane.xlu0 %2730 }
 0x5e3   : > { %v2735_v9 = vsub.f32 %v7025_v60, %v2731_v29 }
 0x5e4   : > { %6089 = vpow2.f32 %v2740_v53 }
 0x5e5   : > { %v2742_v42 = vmul.f32 1.442695, %v2735_v9  ;;  %v3544_v21 = vpop.trf.xlu1 }
 0x5e7   : > { %6091 = vpow2.f32 %v2742_v42 }
 0x5e8   : > { %v3528_v56 = vpop.trf.xlu0 }
 0x5e9   : > { %v3576_v59 = vpop.trf.xlu1 }
 0x5ea   : > { %v3894_v62 = vcombine.low %v3512_v8, %v3576_v59 }
 0x5ec   : > { %v3560_v63 = vpop.trf.xlu0  ;;  %v7100_v13 = vrot.slane %v3894_v62, %v6674_v3 }
 0x5ed   : > { %v3608_v36 = vpop.trf.xlu1  ;;  %v3844_v6 = vcombine.low %v3496_v24, %v3560_v63 }
 0x5ee   : > { %v3902_v58 = vcombine.low %v3544_v21, %v3608_v36 }
 0x5ef   : > { %v3851_v19 = vrot.slane %v3844_v6, %v6674_v3 }
 0x5f0   : > { %v3909_v54 = vrot.slane %v3902_v58, %v6674_v3  ;;  %v3592_v15 = vpop.trf.xlu0 }
 0x5f1   : > { %v6090_v16 = vpop.eup %6089  ;;  %v3852_v17 = vcombine.low %v3528_v56, %v3592_v15  ;;  %v3640_v27 = vpop.trf.xlu1 }
 0x5f2   : > { %v3926_v60 = vcombine.low %v7100_v13, %v3909_v54  ;;  %v2750_v11 = vsel %vm2719_vm2, %v6090_v16, 0.0 }
 0x5f3   : > { %v3859_v35 = vrot.slane %v3852_v17, %v6674_v3  ;;  %2751 = vadd.xlane.f32.xlu0 %v2750_v11 }
 0x5f4   : > { %v6092_v39 = vpop.eup %6091  ;;  %v3624_v31 = vpop.trf.xlu0  ;;  %v3933_v6 = vrot.slane %v3926_v60, %v6677_v10 }
 0x5f5   : > { %v3876_v61 = vcombine.low %v3851_v19, %v3859_v35  ;;  %v2753_v38 = vsel %vm2719_vm2, %v6092_v39, 0.0  ;;  %v3672_v48 = vpop.trf.xlu1 }
 0x5f6   : > { %2754 = vadd.xlane.f32.xlu1 %v2753_v38 }
 0x5f7   : > { %v3883_v42 = vrot.slane %v3876_v61, %v6677_v10 }
 0x5f8   : > { %v3656_v57 = vpop.trf.xlu0 }
 0x5f9   : > { %v3704_v18 = vpop.trf.xlu1 }
 0x5fa   : > { %v3910_v8 = vcombine.low %v3640_v27, %v3704_v18 }
 0x5fc   : > { %v3688_v33 = vpop.trf.xlu0  ;;  %v3917_v29 = vrot.slane %v3910_v8, %v6674_v3 }
 0x5fd   : > { %v3860_v47 = vcombine.low %v3624_v31, %v3688_v33 }
 0x620   : > { %3712 = vxpose.xlu0.c.b16.start.end [1/1] (short) (narrow) %v3163_v51, 16 }
 0x623   : > { %3728 = vxpose.xlu1.c.b16.start.end [1/1] (short) (narrow) %v3231_v34, 16 }
 0x642   : > { %v2746_v0 = vpop.xlane.xlu0 %2745 }
 0x643   : > { %6093 = vrcp.f32 %v2746_v0 }
 0x645   : > { %v2749_v55 = vpop.xlane.xlu1 %2748 }
 0x646   : > { %6095 = vrcp.f32 %v2749_v55 }
 0x650   : > { %v6094_v40 = vpop.eup %6093 }
 0x651   : > { %v2760_v20 = vmul.f32 %v6094_v40, %v6086_v49 }
 0x653   : > { %v6096_v2 = vpop.eup %6095  ;;  %v2764_v5 = vpack.c.bf16 %v2760_v20, %v2760_v20 }
 0x654   : > { %v2761_v14 = vmul.f32 %v6096_v2, %v6088_v41  ;;  %v3867_v41 = vrot.slane %v3860_v47, %v6674_v3  ;;  %v5999_v47 = vld [vmem:[%s6534_s8 + $0x18] sm:$0xff]  }
 0x655   : > { %5855 = vmatprep.subr.msk.bf16.mxu0 %vm2719_vm2, %v2764_v5  ;;  %v3975_v7 = vsel %vm2719_vm2, %v2764_v5, 0 }
 0x656   : > { %5812 = vmatpush3.bf16.xpose.msra.mxu0 %v3975_v7  ;;  %v2765_v26 = vpack.c.bf16 %v2761_v14, %v2761_v14 }
 0x658   : > { %5856 = vmatprep.subr.msk.bf16.mxu1 %vm2719_vm2, %v2765_v26  ;;  %v4033_v52 = vsel %vm2719_vm2, %v2765_v26, 0  ;;  %v5995_v26 = vld [vmem:[%s6534_s8 + $0x38] sm:$0xff]  }
 0x659   : > { %5818 = vmatpush3.bf16.xpose.msra.mxu1 %v4033_v52  ;;  %v5996_v52 = vld [vmem:[%s6534_s8 + $0x30] sm:$0xff]  }
 0x67c   : > { %v2752_v22 = vpop.xlane.xlu0 %2751 }
 0x67d   : > { %6097 = vrcp.f32 %v2752_v22  ;;  %v5997_v22 = vld [vmem:[%s6534_s8 + $0x28] sm:$0xff]  }
 0x67f   : > { %v2755_v25 = vpop.xlane.xlu1 %2754 }
 0x680   : > { %6099 = vrcp.f32 %v2755_v25  ;;  %v5998_v25 = vld [vmem:[%s6534_s8 + $0x20] sm:$0xff]  }
 0x682   : > { %v3720_v49 = vpop.trf.xlu0 }
 0x683   : > { %v3868_v28 = vcombine.low %v3656_v57, %v3720_v49  ;;  %v6000_v49 = vld [vmem:[%s6534_s8 + $0x10] sm:$0xff]  }
 0x685   : > { %v3875_v24 = vrot.slane %v3868_v28, %v6674_v3  ;;  %v3736_v1 = vpop.trf.xlu1 }
 0x686   : > { %v3918_v32 = vcombine.low %v3672_v48, %v3736_v1 }
 0x687   : > { %v3884_v53 = vcombine.low %v3867_v41, %v3875_v24 }
 0x688   : > { %v3925_v9 = vrot.slane %v3918_v32, %v6674_v3 }
 0x689   : > { %v3891_v21 = vrot.slane %v3884_v53, %v6677_v10 }
 0x68a   : > { %v6098_v56 = vpop.eup %6097  ;;  %v3934_v59 = vcombine.low %v3917_v29, %v3925_v9 }
 0x68b   : > { %v3892_v62 = vcombine.low %v3883_v42, %v3891_v21  ;;  %v3893_v63 = vcombine.high %v3883_v42, %v3891_v21  ;;  %v2762_v36 = vmul.f32 %v6098_v56, %v6090_v16 }
 0x68c   : > { %v3941_v58 = vrot.slane %v3934_v59, %v6677_v10 }
 0x68d   : > { %v6100_v13 = vpop.eup %6099  ;;  %v2766_v54 = vpack.c.bf16 %v2762_v36, %v2762_v36  ;;  %v3959_v19 = vshrl.u32 %v3892_v62, 16  ;;  %v3965_v35 = vshrl.u32 %v3893_v63, 16 }
 0x68e   : > { %v3942_v15 = vcombine.low %v3933_v6, %v3941_v58  ;;  %v3943_v17 = vcombine.high %v3933_v6, %v3941_v58  ;;  %v2763_v11 = vmul.f32 %v6100_v13, %v6092_v39  ;;  %v6001_v6 = vld [vmem:[%s6534_s8 + $0x8] sm:$0xff]  }
 0x68f   : > { %5857 = vmatprep.subr.msk.bf16.mxu0 %vm2719_vm2, %v2766_v54  ;;  %v4091_v16 = vsel %vm2719_vm2, %v2766_v54, 0 }
 0x690   : > { %v3958_v61 = vpack.i.b16 %v3942_v15, %v3892_v62  ;;  %v3960_v38 = vshrl.u32 %v3942_v15, 16  ;;  %v3964_v51 = vpack.i.b16 %v3943_v17, %v3893_v63  ;;  %v3966_v34 = vshrl.u32 %v3943_v17, 16 }
 0x691   : > { %v2767_v31 = vpack.c.bf16 %v2763_v11, %v2763_v11 }
 0x692   : > { %5814 = vmatmul.mubr.msk.bf16.vlgmr.msra.gmra.mxu0 %vm2719_vm2, %v3958_v61  ;;  %v3961_v60 = vpack.i.b16 %v3960_v38, %v3959_v19  ;;  %v3967_v27 = vpack.i.b16 %v3966_v34, %v3965_v35 }
 0x693   : > { %5824 = vmatpush3.bf16.xpose.msra.mxu0 %v4091_v16  ;;  %5858 = vmatprep.subr.msk.bf16.mxu1 %vm2719_vm2, %v2767_v31  ;;  %v4149_v39 = vsel %vm2719_vm2, %v2767_v31, 0  ;;  %v6002_v31 = vld [vmem:[%s6534_s8] sm:$0xff]  }
 0x694   : > { %5825 = vmatprep.mubr.msk.bf16.mxu0 %vm2719_vm2, %v3952_v50  ;;  %5820 = vmatmul.mubr.msk.bf16.vlgmr.msra.gmra.mxu1 %vm2719_vm2, %v3961_v60 }
 0x695   : > { %5830 = vmatpush3.bf16.xpose.msra.mxu1 %v4149_v39  ;;  %5831 = vmatprep.mubr.msk.bf16.mxu1 %vm2719_vm2, %v7060_v30 }
 0x696   : > { %5835 = vmatprep.subr.bf16.mxu0 %v6310_v4 }
 0x69a   : > { %5826 = vmatmul.mubr.msk.bf16.vlgmr.msra.gmra.mxu0 %vm2719_vm2, %v3964_v51 }
 0x69b   : > { %5851 = vmatprep.mubr.msk.bf16.mxu0 %vm6312_vm0, %v6310_v4  ;;  %5836 = vmatpush3.bf16.msra.mxu0 %v5995_v26  ;;  %v6111_v26 = vld [vmem:[#allocation2] sm:$0xff] }
 0x69c   : > { %5832 = vmatmul.mubr.msk.bf16.vlgmr.msra.gmra.mxu1 %vm2719_vm2, %v3967_v27  ;;  %5837 = vmatprep.subr.bf16.mxu0 %v6310_v4 }
 0x69d   : > { %4868 = vmatprep.mubr.bf16.mxu1 %v6311_v23 }
 0x69f   : > { %5838 = vmatpush3.bf16.msra.mxu0 %v5996_v52 }
 0x6a0   : > { %5839 = vmatprep.subr.bf16.mxu0 %v6310_v4 }
 0x6a3   : > { %5840 = vmatpush3.bf16.msra.mxu0 %v5997_v22 }
 0x6a4   : > { %5841 = vmatprep.subr.bf16.mxu0 %v6310_v4 }
 0x6a7   : > { %5842 = vmatpush3.bf16.msra.mxu0 %v5998_v25 }
 0x6a8   : > { %5843 = vmatprep.subr.bf16.mxu0 %v6310_v4 }
 0x6ab   : > { %5844 = vmatpush3.bf16.msra.mxu0 %v5999_v47  ;;  %v6003_v47 = vld [vmem:[%s6540_s10 + $0xe0] ss:$16 sps:$4 sm:$0xff]  }
 0x6ac   : > { %5845 = vmatprep.subr.bf16.mxu0 %v6310_v4 }
 0x6af   : > { %5846 = vmatpush3.bf16.msra.mxu0 %v6000_v49  ;;  %v6006_v49 = vld [vmem:[%s6540_s10 + $0xe8] ss:$16 sps:$4 sm:$0xff]  }
 0x6b0   : > { %5847 = vmatprep.subr.bf16.mxu0 %v6310_v4 }
 0x6b3   : > { %5848 = vmatpush3.bf16.msra.mxu0 %v6001_v6  ;;  %v6024_v6 = vld [vmem:[%s6540_s10 + $0x88] ss:$16 sps:$4 sm:$0xff]  }
 0x6b4   : > { %5849 = vmatprep.subr.bf16.mxu0 %v6310_v4 }
 0x6b7   : > { %5850 = vmatpush3.bf16.msra.mxu0 %v6002_v31  ;;  %v6047_v31 = vld [vmem:[%s6540_s10 + $0x4] ss:$16 sps:$4 sm:$0xff]  }
 0x752   : > { %v5815_v37 = vpop.f32.mrf.mxu0 }
 0x754   : > { %v4011_v45 = vpop.f32.mrf.mxu0  ;;  %v5821_v50 = vpop.f32.mrf.mxu1 }
 0x755   : > { %4200 = vxpose.xlu0.b32.start [1/4] (short) (narrow) %v4011_v45, 8 }
 0x756   : > { %v5816_v57 = vpop.f32.mrf.mxu0  ;;  %v4069_v48 = vpop.f32.mrf.mxu1 }
 0x757   : > { %4232 = vxpose.xlu1.b32.start [1/4] (short) (narrow) %v4069_v48, 8 }
 0x758   : > { %v4014_v33 = vpop.f32.mrf.mxu0  ;;  %v5822_v30 = vpop.f32.mrf.mxu1 }
 0x759   : > { %4201 = vxpose.xlu0.b32.cont [2/4] (short) (narrow) %v4014_v33, 8 }
 0x75a   : > { %v4072_v18 = vpop.f32.mrf.mxu1  ;;  %v5827_v0 = vpop.f32.mrf.mxu0 }
 0x75b   : > { %4233 = vxpose.xlu1.b32.cont [2/4] (short) (narrow) %v4072_v18, 8 }
 0x75c   : > { %v5833_v55 = vpop.f32.mrf.mxu1  ;;  %v4127_v40 = vpop.f32.mrf.mxu0 }
 0x75d   : > { %4202 = vxpose.xlu0.b32.cont [3/4] (short) (narrow) %v5815_v37, 8 }
 0x75e   : > { %v4185_v20 = vpop.f32.mrf.mxu1  ;;  %v5828_v2 = vpop.f32.mrf.mxu0 }
 0x75f   : > { %4234 = vxpose.xlu1.b32.cont [3/4] (short) (narrow) %v5821_v50, 8 }
 0x760   : > { %v5834_v5 = vpop.f32.mrf.mxu1  ;;  %v4130_v14 = vpop.f32.mrf.mxu0 }
 0x761   : > { %4203 = vxpose.xlu0.b32.end [4/4] (short) (narrow) %v5816_v57, 8 }
 0x762   : > { %v4188_v7 = vpop.f32.mrf.mxu1 }
 0x763   : > { %4235 = vxpose.xlu1.b32.end [4/4] (short) (narrow) %v5822_v30, 8 }
 0x765   : > { %4264 = vxpose.xlu0.b32.start [1/4] (short) (narrow) %v4127_v40, 8 }
 0x767   : > { %4296 = vxpose.xlu1.b32.start [1/4] (short) (narrow) %v4185_v20, 8 }
 0x769   : > { %4265 = vxpose.xlu0.b32.cont [2/4] (short) (narrow) %v4130_v14, 8 }
 0x76b   : > { %4297 = vxpose.xlu1.b32.cont [2/4] (short) (narrow) %v4188_v7, 8 }
 0x76d   : > { %4266 = vxpose.xlu0.b32.cont [3/4] (short) (narrow) %v5827_v0, 8 }
 0x76f   : > { %4298 = vxpose.xlu1.b32.cont [3/4] (short) (narrow) %v5833_v55, 8 }
 0x771   : > { %4267 = vxpose.xlu0.b32.end [4/4] (short) (narrow) %v5828_v2, 8  ;;  %v5591_v2 = vld [vmem:[%s7365_s5] ss:$0 sm:$0xff] }
 0x773   : > { %4299 = vxpose.xlu1.b32.end [4/4] (short) (narrow) %v5834_v5, 8 }
 0x7d1   : > { %v4216_v28 = vpop.trf.xlu0 }
 0x7d3   : > { %v4248_v8 = vpop.trf.xlu1 }
 0x7e1   : > { %v4280_v41 = vpop.trf.xlu0 }
 0x7e2   : > { %v4328_v24 = vcombine.low %v4216_v28, %v4280_v41  ;;  %v4329_v1 = vcombine.high %v4216_v28, %v4280_v41  ;;  %v6008_v28 = vld [vmem:[%s6540_s10 + $0xec] ss:$16 sps:$4 sm:$0xff]  }
 0x7e3   : > { %v4312_v32 = vpop.trf.xlu1  ;;  %v6014_v41 = vld [vmem:[%s6540_s10 + $0xcc] ss:$16 sps:$4 sm:$0xff]   ;;  %4877 = vmatprep.subr.bf16.mxu0 %v6008_v28  ;;  %v6067_v28 = vld [vmem:[%s7366_s22 + $0x58] sm:$0xff]  }
 0x7e4   : > { %v4344_v53 = vcombine.low %v4248_v8, %v4312_v32  ;;  %v4345_v29 = vcombine.high %v4248_v8, %v4312_v32  ;;  %v4336_v9 = vrot.slane %v4328_v24, %v6674_v3  ;;  %v4343_v42 = vrot.slane %v4329_v1, %v6674_v3  ;;  %v6011_v8 = vld [vmem:[%s6540_s10 + $0xc4] ss:$16 sps:$4 sm:$0xff]   ;;  %v6009_v24 = vld [vmem:[%s6540_s10 + $0xc0] ss:$16 sps:$4 sm:$0xff]   ;;  %v6012_v1 = vld [vmem:[%s6540_s10 + $0xc8] ss:$16 sps:$4 sm:$0xff]  }
 0x7e6   : > { %v4352_v21 = vrot.slane %v4344_v53, %v6674_v3  ;;  %v4359_v56 = vrot.slane %v4345_v29, %v6674_v3 }
 0x7e8   : > { %v4360_v59 = vcombine.low %v4336_v9, %v4352_v21  ;;  %v4361_v62 = vcombine.high %v4336_v9, %v4352_v21  ;;  %v4376_v63 = vcombine.low %v4343_v42, %v4359_v56  ;;  %v4377_v36 = vcombine.high %v4343_v42, %v4359_v56  ;;  %v6015_v42 = vld [vmem:[%s6540_s10 + $0xa0] ss:$16 sps:$4 sm:$0xff]   ;;  %v6017_v21 = vld [vmem:[%s6540_s10 + $0xa4] ss:$16 sps:$4 sm:$0xff]   ;;  %v6018_v56 = vld [vmem:[%s6540_s10 + $0xa8] ss:$16 sps:$4 sm:$0xff]  }
 0x7ea   : > { %v4368_v58 = vrot.slane %v4360_v59, %v6677_v10  ;;  %v4375_v13 = vrot.slane %v4361_v62, %v6677_v10  ;;  %v4384_v54 = vrot.slane %v4376_v63, %v6677_v10  ;;  %v4391_v15 = vrot.slane %v4377_v36, %v6677_v10  ;;  %v6020_v59 = vld [vmem:[%s6540_s10 + $0xac] ss:$16 sps:$4 sm:$0xff]   ;;  %v6023_v62 = vld [vmem:[%s6540_s10 + $0x84] ss:$16 sps:$4 sm:$0xff]   ;;  %v6021_v36 = vld [vmem:[%s6540_s10 + $0x80] ss:$16 sps:$4 sm:$0xff]  }
 0x7eb   : > { %v6026_v63 = vld [vmem:[%s6540_s10 + $0x8c] ss:$16 sps:$4 sm:$0xff]  }
 0x7ec   : > { %v4396_v17 = vcombine.low %v4368_v58, %v4375_v13  ;;  %v5589_v11 = vcombine.high %v4368_v58, %v4375_v13  ;;  %v4412_v19 = vcombine.low %v4384_v54, %v4391_v15  ;;  %v5590_v35 = vcombine.high %v4384_v54, %v4391_v15  ;;  %v6029_v58 = vld [vmem:[%s6540_s10 + $0x64] ss:$16 sps:$4 sm:$0xff]   ;;  %v6032_v13 = vld [vmem:[%s6540_s10 + $0x6c] ss:$16 sps:$4 sm:$0xff]   ;;  %v6027_v54 = vld [vmem:[%s6540_s10 + $0x60] ss:$16 sps:$4 sm:$0xff]  }
 0x7ed   : > { %v6030_v15 = vld [vmem:[%s6540_s10 + $0x68] ss:$16 sps:$4 sm:$0xff]  }
 0x7ee   : > { %v4403_v61 = vrot.slane %v4396_v17, %v6674_v3  ;;  %v4411_v38 = vrot.slane %v5589_v11, %v6674_v3  ;;  %v4419_v51 = vrot.slane %v4412_v19, %v6674_v3  ;;  %v4427_v34 = vrot.slane %v5590_v35, %v6674_v3  ;;  %v6035_v17 = vld [vmem:[%s6540_s10 + $0x44] ss:$16 sps:$4 sm:$0xff]   ;;  %v6038_v11 = vld [vmem:[%s6540_s10 + $0x4c] ss:$16 sps:$4 sm:$0xff]   ;;  %v6033_v19 = vld [vmem:[%s6540_s10 + $0x40] ss:$16 sps:$4 sm:$0xff]  }
 0x7ef   : > { %v6036_v35 = vld [vmem:[%s6540_s10 + $0x48] ss:$16 sps:$4 sm:$0xff]  }
 0x7f0   : > { %v4429_v16 = vcombine.high %v4403_v61, %v4411_v38  ;;  %v4445_v60 = vcombine.high %v4419_v51, %v4427_v34  ;;  %v4428_v27 = vcombine.low %v4403_v61, %v4411_v38  ;;  %v4444_v39 = vcombine.low %v4419_v51, %v4427_v34  ;;  %v6041_v61 = vld [vmem:[%s6540_s10 + $0x24] ss:$16 sps:$4 sm:$0xff]   ;;  %v6044_v38 = vld [vmem:[%s6540_s10 + $0x2c] ss:$16 sps:$4 sm:$0xff]   ;;  %v6039_v51 = vld [vmem:[%s6540_s10 + $0x20] ss:$16 sps:$4 sm:$0xff]  }
 0x7f1   : > { %v6042_v34 = vld [vmem:[%s6540_s10 + $0x28] ss:$16 sps:$4 sm:$0xff]  }
 0x7f2   : > { %v4443_v37 = vrot.slane %v4429_v16, %v6677_v10  ;;  %v4459_v45 = vrot.slane %v4445_v60, %v6677_v10  ;;  %v4436_v4 = vrot.slane %v4428_v27, %v6677_v10  ;;  %v4452_v50 = vrot.slane %v4444_v39, %v6677_v10  ;;  %v6050_v16 = vld [vmem:[%s6540_s10 + $0xc] ss:$16 sps:$4 sm:$0xff]   ;;  %v6045_v60 = vld [vmem:[%s6540_s10] ss:$16 sps:$4 sm:$0xff]   ;;  %v6048_v27 = vld [vmem:[%s6540_s10 + $0x8] ss:$16 sps:$4 sm:$0xff]  }
 0x7f3   : > { %v6051_v39 = vld [vmem:[%s7366_s22 + $0x78] sm:$0xff]  }
 0x7f4   : > { %v4462_v57 = vcombine.low %v4443_v37, %v4459_v45  ;;  %v4461_v48 = vcombine.high %v4436_v4, %v4452_v50  ;;  %v4460_v33 = vcombine.low %v4436_v4, %v4452_v50  ;;  %v4463_v3 = vcombine.high %v4443_v37, %v4459_v45  ;;  %v6052_v37 = vld [vmem:[%s7366_s22 + $0xf8] sm:$0xff]  }
 0x7f6   : > { %4469 = vrot.lane.b32.xlu1 %v4462_v57, %s6315_s23  ;;  %4465 = vrot.lane.b32.xlu0 %v4461_v48, %s6313_s0  ;;  %v5600_v48 = vld [vmem:[%s708_s11] ss:$0 sm:$0xff] }
 0x7fa   : > { %4473 = vrot.lane.b32.xlu1 %v4463_v3, %s6314_s20  ;;  %v5601_v3 = vld [vmem:[%s711_s26] ss:$0 sm:$0xff] }
 0x868   : > { %v4470_v30 = vpop.permute.xlu1 %4469  ;;  %v4466_v18 = vpop.permute.xlu0 %4465 }
 0x869   : > { %v4476_v0 = vsel %vm2546_vm1, %v4460_v33, %v4466_v18 }
 0x86a   : > { %v4478_v10 = vsel %vm4477_vm3, %v4476_v0, %v4470_v30  ;;  %v6053_v0 = vld [vmem:[%s7366_s22 + $0x38] sm:$0xff]  }
 0x86c   : > { %v4474_v55 = vpop.permute.xlu1 %4473 }
 0x86d   : > { %v4480_v40 = vsel %vm4479_vm4, %v4478_v10, %v4474_v55  ;;  %v6054_v55 = vld [vmem:[%s7366_s22 + $0xb8] sm:$0xff]  }
 0x86e   : > { %v4481_v20 = vpack.c.bf16 %v4480_v40, %v4480_v40  ;;  %v6055_v40 = vld [vmem:[%s7366_s22 + $0x70] sm:$0xff]  }
 0x870   : > { %5852 = vmatmul.mubr.bf16.vlgmr.msra.gmra.mxu0 %v4481_v20  ;;  %v6056_v20 = vld [vmem:[%s7366_s22 + $0xf0] sm:$0xff]  }
 0x871   : > { %4909 = vmatprep.mubr.bf16.mxu0 %v6311_v23  ;;  %v6005_v23 = vld [vmem:[%s6540_s10 + $0xe4] ss:$16 sps:$4 sm:$0xff]   ;;  %4878 = vmatpush1.bf16.msra.mxu0 %v6006_v49  ;;  %v6066_v49 = vld [vmem:[%s7366_s22 + $0xa0] sm:$0xff]  }
 0x872   : > { %4836 = vmatprep.subr.bf16.mxu1 %v6005_v23  ;;  %4879 = vmatprep.subr.bf16.mxu0 %v6014_v41  ;;  %v6065_v23 = vld [vmem:[%s7366_s22 + $0x20] sm:$0xff]   ;;  %v6069_v41 = vld [vmem:[%s7366_s22 + $0x18] sm:$0xff]  }
 0x873   : > { %4837 = vmatpush1.bf16.msra.mxu1 %v6003_v47  ;;  %v6064_v47 = vld [vmem:[%s7366_s22 + $0xe0] sm:$0xff]  }
 0x874   : > { %4838 = vmatprep.subr.bf16.mxu1 %v6011_v8  ;;  %v6068_v8 = vld [vmem:[%s7366_s22 + $0xd8] sm:$0xff]  }
 0x875   : > { %4880 = vmatpush1.bf16.msra.mxu0 %v6012_v1  ;;  %v6071_v1 = vld [vmem:[%s7366_s22 + $0x50] sm:$0xff]  }
 0x876   : > { %4881 = vmatprep.subr.bf16.mxu0 %v6020_v59  ;;  %v6079_v59 = vld [vmem:[%s7366_s22 + $0x40] sm:$0xff]  }
 0x877   : > { %4839 = vmatpush1.bf16.msra.mxu1 %v6009_v24  ;;  %v6070_v24 = vld [vmem:[%s7366_s22 + $0x98] sm:$0xff]  }
 0x878   : > { %4840 = vmatprep.subr.bf16.mxu1 %v6017_v21  ;;  %v6077_v21 = vld [vmem:[%s7366_s22 + $0x8] sm:$0xff]  }
 0x879   : > { %4882 = vmatpush1.bf16.msra.mxu0 %v6018_v56  ;;  %v6078_v56 = vld [vmem:[%s7366_s22 + $0x88] sm:$0xff]  }
 0x87a   : > { %4883 = vmatprep.subr.bf16.mxu0 %v6026_v63  ;;  %v6081_v63 = vld [vmem:[%s7366_s22] sm:$0xff]  }
 0x87b   : > { %4841 = vmatpush1.bf16.msra.mxu1 %v6015_v42  ;;  %v6076_v42 = vld [vmem:[%s7366_s22 + $0xc8] sm:$0xff]  }
 0x87c   : > { %4842 = vmatprep.subr.bf16.mxu1 %v6023_v62  ;;  %v6080_v62 = vld [vmem:[%s7366_s22 + $0xc0] sm:$0xff]  }
 0x87d   : > { %4884 = vmatpush1.bf16.msra.mxu0 %v6024_v6  ;;  %v4654_v6 = vld [vmem:[%s6591_s19] sm:$0xf] }
 0x87e   : > { %4885 = vmatprep.subr.bf16.mxu0 %v6032_v13  ;;  %v4659_v13 = vrot.slane %v4654_v6, %v796_v46 }
 0x87f   : > { %4843 = vmatpush1.bf16.msra.mxu1 %v6021_v36  ;;  %v6082_v36 = vld [vmem:[%s7366_s22 + $0x80] sm:$0xff]  }
 0x880   : > { %4844 = vmatprep.subr.bf16.mxu1 %v6029_v58  ;;  %v4670_v58 = vsub.s32 3, %v6647_v43 }
 0x881   : > { %4886 = vmatpush1.bf16.msra.mxu0 %v6030_v15 }
 0x882   : > { %4887 = vmatprep.subr.bf16.mxu0 %v6038_v11  ;;  %v4663_v11 = vrot.slane %v4654_v6, %v800_v44 }
 0x883   : > { %4845 = vmatpush1.bf16.msra.mxu1 %v6027_v54  ;;  %v4667_v54 = vrot.slane %v4654_v6, %v804_v12 }
 0x884   : > { %4846 = vmatprep.subr.bf16.mxu1 %v6035_v17 }
 0x885   : > { %4888 = vmatpush1.bf16.msra.mxu0 %v6036_v35 }
 0x886   : > { %4889 = vmatprep.subr.bf16.mxu0 %v6044_v38 }
 0x887   : > { %4847 = vmatpush1.bf16.msra.mxu1 %v6033_v19  ;;  %v4671_v19 = vrot.slane %v4654_v6, %v4670_v58 }
 0x888   : > { %4848 = vmatprep.subr.bf16.mxu1 %v6041_v61 }
 0x889   : > { %4890 = vmatpush1.bf16.msra.mxu0 %v6042_v34 }
 0x88a   : > { %4891 = vmatprep.subr.bf16.mxu0 %v6050_v16 }
 0x88b   : > { %4849 = vmatpush1.bf16.msra.mxu1 %v6039_v51 }
 0x88c   : > { %4850 = vmatprep.subr.bf16.mxu1 %v6047_v31 }
 0x88d   : > { %4892 = vmatpush1.bf16.msra.mxu0 %v6048_v27 }
 0x88e   : > { %5737 = vmatprep.subr.bf16.mxu0 %v6052_v37 }
 0x88f   : > { %4851 = vmatpush1.bf16.msra.mxu1 %v6045_v60 }
 0x890   : > { %5715 = vmatprep.subr.bf16.mxu1 %v6051_v39 }
 0x930   : > { %v4587_v5 = vpop.f32.mrf.mxu0 }
 0x931   : > { %v4588_v14 = vadd.f32 %v5591_v2, %v4587_v5  ;;  %v6057_v2 = vld [vmem:[%s7366_s22 + $0x30] sm:$0xff]  }
 0x932   : > { %v5853_v7 = vpop.f32.mrf.mxu0  ;;  %v6058_v5 = vld [vmem:[%s7366_s22 + $0xb0] sm:$0xff]  }
 0x933   : > { %v7181_v52 = vadd.f32 %v6111_v26, %v4588_v14  ;;  %v6059_v14 = vld [vmem:[%s7366_s22 + $0x68] sm:$0xff]  }
 0x934   : > { %v4590_v22 = vpop.f32.mrf.mxu0  ;;  %v6060_v7 = vld [vmem:[%s7366_s22 + $0xe8] sm:$0xff]  }
 0x935   : > { %4596 = vadd.xlane.f32.xlu0 %v7181_v52  ;;  %v6061_v26 = vld [vmem:[%s7366_s22 + $0x28] sm:$0xff]  }
 0x936   : > { %v5854_v25 = vpop.f32.mrf.mxu0  ;;  %v6062_v22 = vld [vmem:[%s7366_s22 + $0xa8] sm:$0xff]  }
 0x937   : > { %v6063_v25 = vld [vmem:[%s7366_s22 + $0x60] sm:$0xff]  }
 0x9be   : > { %v4597_v32 = vpop.xlane.xlu0 %4596 }
 0x9bf   : > { %v4598_v53 = vmul.f32 0.0078125, %v4597_v32  ;;  %v6072_v32 = vld [vmem:[%s7366_s22 + $0xd0] sm:$0xff]  }
 0x9c1   : > { %v4599_v29 = vsub.f32 %v7181_v52, %v4598_v53  ;;  %v6073_v53 = vld [vmem:[%s7366_s22 + $0x10] sm:$0xff]  }
 0x9c3   : > { %v4600_v9 = vmul.f32 %v4599_v29, %v4599_v29 }
 0x9c5   : > { %4601 = vadd.xlane.f32.xlu1 %v4600_v9  ;;  %v6075_v9 = vld [vmem:[%s7366_s22 + $0x48] sm:$0xff]  }
 0xa4e   : > { %v4602_v45 = vpop.xlane.xlu1 %4601 }
 0xa4f   : > { %v4603_v4 = vmul.f32 0.0078125, %v4602_v45 }
 0xa51   : > { %v4604_v50 = vadd.f32 1e-05, %v4603_v4 }
 0xa53   : > { %6101 = vrsqrt.f32 %v4604_v50 }
 0xa60   : > { %v6102_v57 = vpop.eup %6101 }
 0xa61   : > { %v4606_v33 = vmul.f32 %v6102_v57, %v4599_v29  ;;  %v6074_v29 = vld [vmem:[%s7366_s22 + $0x90] sm:$0xff]  }
 0xa63   : > { %v4613_v30 = vmul.f32 %v5600_v48, %v4606_v33 }
 0xa65   : > { %v4620_v18 = vadd.f32 %v5601_v3, %v4613_v30 }
 0xa67   : > { %v4621_v10 = vpack.c.bf16 %v4620_v18, %v4620_v18 }
 0xa69   : > { %4869 = vmatmul.mubr.bf16.vlgmr.msra.gmra.mxu1 %v4621_v10  ;;  %4910 = vmatmul.mubr.bf16.vlgmr.msra.gmra.mxu0 %v4621_v10 }
 0xa6a   : > { %5716 = vmatpush3.bf16.msra.mxu1 %v6053_v0  ;;  %5738 = vmatpush3.bf16.msra.mxu0 %v6054_v55 }
 0xa6b   : > { %5717 = vmatprep.subr.bf16.mxu1 %v6055_v40  ;;  %5739 = vmatprep.subr.bf16.mxu0 %v6056_v20 }
 0xa6e   : > { %5718 = vmatpush3.bf16.msra.mxu1 %v6057_v2  ;;  %5740 = vmatpush3.bf16.msra.mxu0 %v6058_v5 }
 0xa6f   : > { %5719 = vmatprep.subr.bf16.mxu1 %v6059_v14  ;;  %5741 = vmatprep.subr.bf16.mxu0 %v6060_v7 }
 0xa72   : > { %5720 = vmatpush3.bf16.msra.mxu1 %v6061_v26  ;;  %5742 = vmatpush3.bf16.msra.mxu0 %v6062_v22 }
 0xa73   : > { %5721 = vmatprep.subr.bf16.mxu1 %v6063_v25  ;;  %5743 = vmatprep.subr.bf16.mxu0 %v6064_v47  ;;  %v5634_v47 = vld [vmem:[%s718_s3] ss:$0 sm:$0xff] }
 0xa76   : > { %5722 = vmatpush3.bf16.msra.mxu1 %v6065_v23  ;;  %5744 = vmatpush3.bf16.msra.mxu0 %v6066_v49 }
 0xa77   : > { %5723 = vmatprep.subr.bf16.mxu1 %v6067_v28  ;;  %5745 = vmatprep.subr.bf16.mxu0 %v6068_v8 }
 0xa7a   : > { %5724 = vmatpush3.bf16.msra.mxu1 %v6069_v41  ;;  %5746 = vmatpush3.bf16.msra.mxu0 %v6070_v24 }
 0xa7b   : > { %5725 = vmatprep.subr.bf16.mxu1 %v6071_v1  ;;  %5747 = vmatprep.subr.bf16.mxu0 %v6072_v32 }
 0xa7e   : > { %5726 = vmatpush3.bf16.msra.mxu1 %v6073_v53  ;;  %5748 = vmatpush3.bf16.msra.mxu0 %v6074_v29 }
 0xa7f   : > { %5727 = vmatprep.subr.bf16.mxu1 %v6075_v9  ;;  %5749 = vmatprep.subr.bf16.mxu0 %v6076_v42 }
 0xa82   : > { %5728 = vmatpush3.bf16.msra.mxu1 %v6077_v21  ;;  %5750 = vmatpush3.bf16.msra.mxu0 %v6078_v56 }
 0xa83   : > { %5729 = vmatprep.subr.bf16.mxu1 %v6079_v59  ;;  %5751 = vmatprep.subr.bf16.mxu0 %v6080_v62 }
 0xa86   : > { %5730 = vmatpush3.bf16.msra.mxu1 %v6081_v63  ;;  %5752 = vmatpush3.bf16.msra.mxu0 %v6082_v36 }
 0xb29   : > { %v4870_v15 = vpop.f32.mrf.mxu1  ;;  %v4911_v17 = vpop.f32.mrf.mxu0 }
 0xb2a   : > { %v4871_v35 = vadd.f32 %v4870_v15, %v4659_v13  ;;  %v4912_v61 = vadd.f32 %v4911_v17, %v4667_v54 }
 0xb2b   : > { %v4872_v38 = vpop.f32.mrf.mxu1  ;;  %v4913_v51 = vpop.f32.mrf.mxu0 }
 0xb2c   : > { %v4922_v34 = vmul.f32 0.70710677, %v4871_v35  ;;  %v4924_v31 = vmul.f32 0.70710677, %v4912_v61  ;;  %v4873_v16 = vadd.f32 %v4872_v38, %v4663_v11  ;;  %v4914_v60 = vadd.f32 %v4913_v51, %v4671_v19 }
 0xb2d   : > { %v4874_v27 = vpop.f32.mrf.mxu1  ;;  %v4915_v39 = vpop.f32.mrf.mxu0  ;;  %v4918_v48 = vmul.f32 0.5, %v4871_v35  ;;  %v4920_v3 = vmul.f32 0.5, %v4912_v61 }
 0xb2e   : > { %6103 = verf.f32 %v4922_v34  ;;  %v4923_v46 = vmul.f32 0.70710677, %v4873_v16  ;;  %v4925_v45 = vmul.f32 0.70710677, %v4914_v60  ;;  %v4919_v30 = vmul.f32 0.5, %v4873_v16 }
 0xb2f   : > { %6105 = verf.f32 %v4924_v31  ;;  %v4875_v12 = vpop.f32.mrf.mxu1  ;;  %v4916_v37 = vpop.f32.mrf.mxu0  ;;  %v4921_v55 = vmul.f32 0.5, %v4914_v60 }
 0xb30   : > { %6107 = verf.f32 %v4923_v46 }
 0xb31   : > { %6109 = verf.f32 %v4925_v45 }
 0xb3b   : > { %v6104_v43 = vpop.eup %6103 }
 0xb3c   : > { %v6106_v44 = vpop.eup %6105  ;;  %v4930_v4 = vadd.f32 1.0, %v6104_v43 }
 0xb3d   : > { %v4932_v50 = vadd.f32 1.0, %v6106_v44  ;;  %v6108_v57 = vpop.eup %6107 }
 0xb3e   : > { %v6110_v33 = vpop.eup %6109  ;;  %v4931_v18 = vadd.f32 1.0, %v6108_v57  ;;  %v4934_v0 = vmul.f32 %v4930_v4, %v4918_v48 }
 0xb3f   : > { %v4933_v10 = vadd.f32 1.0, %v6110_v33  ;;  %v4936_v40 = vmul.f32 %v4932_v50, %v4920_v3 }
 0xb40   : > { %v4935_v20 = vmul.f32 %v4931_v18, %v4919_v30  ;;  %v4938_v14 = vpack.c.bf16 %v4934_v0, %v4934_v0 }
 0xb41   : > { %v4937_v2 = vmul.f32 %v4933_v10, %v4921_v55  ;;  %v4940_v26 = vpack.c.bf16 %v4936_v40, %v4936_v40 }
 0xb42   : > { %v4939_v5 = vpack.c.bf16 %v4935_v20, %v4935_v20 }
 0xb43   : > { %v4941_v7 = vpack.c.bf16 %v4937_v2, %v4937_v2 }
 0xb44   : > { %5237 = vmatprep.mubr.bf16.mxu1 %v4939_v5 }
 0xb45   : > { %5277 = vmatprep.mubr.bf16.mxu0 %v4941_v7  ;;  %5238 = vmatmul.mubr.bf16.vlgmr.msra.gmra.mxu1 %v4938_v14 }
 0xb46   : > { %5278 = vmatmul.mubr.bf16.vlgmr.msra.gmra.mxu0 %v4940_v26 }
 0xc05   : > { %v5731_v22 = vpop.f32.mrf.mxu1 }
 0xc06   : > { %v5753_v25 = vpop.f32.mrf.mxu0 }
 0xc07   : > { %v5732_v23 = vpop.f32.mrf.mxu1 }
 0xc08   : > { %v5733_v49 = vadd.f32 %v5732_v23, %v5731_v22  ;;  %v5754_v28 = vpop.f32.mrf.mxu0 }
 0xc09   : > { %v5734_v8 = vpop.f32.mrf.mxu1  ;;  %v5755_v24 = vadd.f32 %v5754_v28, %v5753_v25 }
 0xc0a   : > { %v5240_v41 = vadd.f32 %v5733_v49, %v5634_v47  ;;  %v5756_v1 = vpop.f32.mrf.mxu0 }
 0xc0b   : > { %v5735_v32 = vpop.f32.mrf.mxu1 }
 0xc0c   : > { %v5280_v53 = vadd.f32 %v5755_v24, %v5240_v41  ;;  %v5757_v29 = vpop.f32.mrf.mxu0  ;;  %5290 = sbr.rel (%p5667_p7) target bundleno = 3097 (0xc19), region = 96 }
 0xc0e   : > { %v5285_v9 = vadd.f32 %v5280_v53, %v7181_v52 }
 0xc10   : > { %5286 = vst [vmem:[#allocation2] sm:$0xff] %v5285_v9 }
 0xc17   : > { %v5291_v42 = vld [vmem:[#allocation2] sm:$0xff] }
 0xc18   : > { %5292 = vst [vmem:[%s6596_s30] sm:$0xff] %v5291_v42 }
 0xc19 PF: > { %s7370_s3 = sld [smem:[#allocation17_spill]] }
 0xc1a   : > { %s7371_s25 = sld [smem:[#allocation13_spill]] }
 0xc1b   : > { %s7372_s26 = sld [smem:[#allocation14_spill]] }
 0xc1c   : > { %s7373_s27 = sld [smem:[#allocation20_spill]] }
 0xc1d   : > { %s7374_s28 = sld [smem:[#allocation15_spill]] }
 0xc1e   : > { %s7375_s29 = sld [smem:[#allocation16_spill]] }
 0xc1f   : > { %s32_s15 = sadd.s32 1, %s7370_s3   ;;  %s7376_s30 = sld [smem:[#allocation18_spill]] }
 0xc20   : > { %p29_p13 = scmp.ge.s32.totalorder %s32_s15, 6   ;;  %s7377_s14 = sld [smem:[#allocation19_spill]] }
 0xc22   :  { %31 = sbr.rel (!%p29_p13) target bundleno = 22 (0x16), region = 184 }
 0xc27   :  { %5312 = vsyncpa [#allocation4], 1 }
 0xc28   :  { %5314 = vsyncpa [#allocation4 + $0x1], 1 }
 0xc29   :  { %5315 = vsyncpa [#allocation6], 1 }
 0xc2a   :  { %5317 = vsyncpa [#allocation6 + $0x1], 1 }
 0xc2b   :  { %5318 = vsyncpa [#allocation9], 1 }
 0xc2c   :  { %5320 = vsyncpa [#allocation9 + $0x1], 1 }

</bundles_post_ra>
